<compile_context>
chip_gen: v6e
topology: v6e:2x2x1
jax: 0.10.0
libtpu: 0.0.40
codegen_flags: <defaults>
</compile_context>

<pallas_src>
import functools

import jax
import jax.numpy as jnp
from jax.experimental import pallas as pl
from jax.experimental.pallas import tpu as pltpu


_LANE = 128
_VMEM_LIMIT = 48 * 1024 * 1024   # valid on v5e/v6e (128 MiB) and v7x (64 MiB)
_TILE_BUDGET = 8 * 1024 * 1024   # x + out (f32) + padded mask (bf16) per tile


def _calculate_gamma(W, block_size, p):
    invalid = (1.0 - p) / (block_size ** 2)
    valid = (W ** 2) / ((W - block_size + 1) ** 2)
    return invalid * valid


def _separable_max_pool(mp, H, W, bs):
    """mp: (H+bs-1, W+bs-1, Cb) f32 zero-padded mask -> (H, W, Cb) max pool."""
    row = mp[:, 0:W, :]
    for dj in range(1, bs):                       # (bs-1) maxima along W
        row = jnp.maximum(row, mp[:, dj:dj + W, :])
    pooled = row[0:H]
    for di in range(1, bs):                       # (bs-1) maxima along H
        pooled = jnp.maximum(pooled, row[di:di + H])
    return pooled


def _pool_sum_kernel(maskp_ref, part_ref, *, H, W, bs):
    """Per channel-tile partial sum of the pooled mask (mask traffic only)."""
    pooled = _separable_max_pool(maskp_ref[...].astype(jnp.float32), H, W, bs)
    part = jnp.sum(pooled)
    part_ref[...] = jnp.full(part_ref.shape, part, dtype=part_ref.dtype)


def _dropblock_kernel(scale_ref, x_ref, maskp_ref, o_ref, *, H, W, bs):
    """Fused max-pool + (1 - pooled) * x * scale for one channel tile."""
    pooled = _separable_max_pool(maskp_ref[...].astype(jnp.float32), H, W, bs)
    mask_block = 1.0 - pooled
    scale = scale_ref[0]                                   # SMEM scalar
    y = mask_block * x_ref[...].astype(jnp.float32) * scale
    o_ref[...] = y.astype(o_ref.dtype)


def _pick_channel_tile(NC_pad, H, W, Hp, Wp):
    """Largest 128-multiple channel tile that divides NC_pad and fits budget."""
    if NC_pad < _LANE:
        return NC_pad

    def tile_bytes(cb):
        return 2 * (H * W * cb * 4) + Hp * Wp * cb * 2

    cb = _LANE
    while (cb * 2 <= NC_pad and NC_pad % (cb * 2) == 0
           and tile_bytes(cb * 2) <= _TILE_BUDGET):
        cb *= 2
    return cb


def dropblock(x, key, *, block_size=5, p=0.1, training=True):
    """JAX/Pallas equivalent of DropBlock.forward (NCHW input)."""
    if not training:
        return x
    N, C, H, W = x.shape
    bs = block_size
    assert bs % 2 == 1, "odd block_size assumed (PyTorch module default is 5)"
    # TODO(synk): even block_size needs the asymmetric F.pad/max_pool geometry.

    gamma = _calculate_gamma(W, bs, p)
    NC = N * C
    mask = jax.random.bernoulli(key, gamma, (NC, H - bs + 1, W - bs + 1))

    # Channels-last, lane-dense layout: N*C on lanes.
    x_cl = jnp.transpose(x.reshape(NC, H, W), (1, 2, 0))            # (H, W, NC)
    mask_cl = jnp.transpose(mask, (1, 2, 0)).astype(jnp.bfloat16)   # (H-bs+1, W-bs+1, NC)

    side = 2 * (bs // 2)                # combined zero pad (see header note)
    Hp, Wp = H + bs - 1, W + bs - 1
    maskp = jnp.pad(mask_cl, ((side, side), (side, side), (0, 0)))  # (Hp, Wp, NC)

    # Pad channels so tiles can be 128-lane-dense when NC is large.
    NC_pad = (-(-NC // _LANE) * _LANE) if NC >= _LANE else NC
    if NC_pad != NC:
        x_cl = jnp.pad(x_cl, ((0, 0), (0, 0), (0, NC_pad - NC)))
        maskp = jnp.pad(maskp, ((0, 0), (0, 0), (0, NC_pad - NC)))

    c_blk = _pick_channel_tile(NC_pad, H, W, Hp, Wp)
    n_tiles = NC_pad // c_blk

    cparams = pltpu.CompilerParams(
        dimension_semantics=("parallel",),   # v7x: shard channel tiles over 2 TCs
        vmem_limit_bytes=_VMEM_LIMIT,
    )

    # ---- pass 1: per-tile partial sums of the pooled mask -> global scale ----
    partials = pl.pallas_call(
        functools.partial(_pool_sum_kernel, H=H, W=W, bs=bs),
        grid=(n_tiles,),
        in_specs=[pl.BlockSpec((Hp, Wp, c_blk), lambda i: (0, 0, i))],
        out_specs=pl.BlockSpec((1, 8, _LANE), lambda i: (i, 0, 0)),
        out_shape=jax.ShapeDtypeStruct((n_tiles, 8, _LANE), jnp.float32),
        compiler_params=cparams,
    )(maskp)
    sum_pooled = jnp.sum(partials[:, 0, 0])

    numel = float(N * C * H * W)            # mask_block.numel()
    total = numel - sum_pooled              # == mask_block.sum() (exact: 0/1 values)
    total = jnp.maximum(total, 1.0)         # guard the all-blocked degenerate case
    scale = jnp.reshape(numel / total, (1,)).astype(jnp.float32)

    # ---- pass 2: fused max-pool + mask + rescale over x (tiled, pipelined) ----
    y_cl = pl.pallas_call(
        functools.partial(_dropblock_kernel, H=H, W=W, bs=bs),
        grid=(n_tiles,),
        in_specs=[
            pl.BlockSpec(memory_space=pltpu.MemorySpace.SMEM),      # scale scalar
            pl.BlockSpec((H, W, c_blk), lambda i: (0, 0, i)),       # x tile
            pl.BlockSpec((Hp, Wp, c_blk), lambda i: (0, 0, i)),     # padded mask tile
        ],
        out_specs=pl.BlockSpec((H, W, c_blk), lambda i: (0, 0, i)),
        out_shape=jax.ShapeDtypeStruct((H, W, NC_pad), x.dtype),
        compiler_params=cparams,
    )(scale, x_cl, maskp)

    y = jnp.transpose(y_cl[:, :, :NC], (2, 0, 1)).reshape(N, C, H, W)
    return y


def _dropblock_reference(x, key, *, block_size=5, p=0.1):
    """Pure-JAX (XLA) mirror of the PyTorch forward, for validation."""
    N, C, H, W = x.shape
    bs = block_size
    gamma = _calculate_gamma(W, bs, p)
    NC = N * C
    mask = jax.random.bernoulli(
        key, gamma, (NC, H - bs + 1, W - bs + 1)).astype(jnp.float32)
    pad = bs // 2
    m = jnp.pad(mask, ((0, 0), (pad, pad), (pad, pad)))                         # F.pad (0)
    m = jnp.pad(m, ((0, 0), (pad, pad), (pad, pad)), constant_values=-jnp.inf)  # pool pad
    pooled = jax.lax.reduce_window(m, -jnp.inf, jax.lax.max,
                                   (1, bs, bs), (1, 1, 1), "VALID")
    mask_block = 1.0 - pooled                                                   # (NC, H, W)
    total = jnp.maximum(jnp.sum(mask_block), 1.0)
    scale = mask_block.size / total
    return (mask_block.reshape(N, C, H, W) * x * scale).astype(x.dtype)


if __name__ == "__main__":
    key = jax.random.PRNGKey(0)
    k_x, k_mask = jax.random.split(key)

    N, C, H, W = 2, 4, 16, 16
    x = jax.random.normal(k_x, (N, C, H, W), dtype=jnp.float32)

    y = dropblock(x, k_mask, block_size=5, p=0.1, training=True)
    y = jax.block_until_ready(y)

    assert y.shape == x.shape and y.dtype == x.dtype
    assert bool(jnp.all(jnp.isfinite(y)))

    y_ref = _dropblock_reference(x, k_mask, block_size=5, p=0.1)
    assert bool(jnp.allclose(y, y_ref, rtol=1e-5, atol=1e-5)), \
        float(jnp.max(jnp.abs(y - y_ref)))

    print("KERNEL_OK")
</pallas_src>

<mosaic_0001>
module attributes {stable_mosaic.version = 11 : i64} {
  func.func @_pool_sum_kernel(%arg0: i32, %arg1: memref<20x20x8xbf16, #tpu.memory_space<vmem>>, %arg2: memref<1x8x128xf32, #tpu.memory_space<vmem>>) attributes {dimension_semantics = [#tpu.dimension_semantics<parallel>], iteration_bounds = array<i64: 1>, scalar_prefetch = 0 : i64, scratch_operands = 0 : i64, tpu.core_type = #tpu.core_type<tc>, window_params = [{transform_indices = @transform_0, window_bounds = array<i64: 20, 20, 8>}, {transform_indices = @transform_1, window_bounds = array<i64: 1, 8, 128>}]} {
    %c0 = arith.constant 0 : index
    %c0_0 = arith.constant 0 : index
    %c0_1 = arith.constant 0 : index
    %0 = vector.load %arg1[%c0, %c0_0, %c0_1] : memref<20x20x8xbf16, #tpu.memory_space<vmem>>, vector<20x20x8xbf16>
    %1 = arith.extf %0 : vector<20x20x8xbf16> to vector<20x20x8xf32>
    %2 = vector.extract_strided_slice %1 {offsets = [0, 0, 0], sizes = [20, 16, 8], strides = [1, 1, 1]} : vector<20x20x8xf32> to vector<20x16x8xf32>
    %3 = vector.extract_strided_slice %1 {offsets = [0, 1, 0], sizes = [20, 16, 8], strides = [1, 1, 1]} : vector<20x20x8xf32> to vector<20x16x8xf32>
    %4 = arith.maximumf %2, %3 : vector<20x16x8xf32>
    %5 = vector.extract_strided_slice %1 {offsets = [0, 2, 0], sizes = [20, 16, 8], strides = [1, 1, 1]} : vector<20x20x8xf32> to vector<20x16x8xf32>
    %6 = arith.maximumf %4, %5 : vector<20x16x8xf32>
    %7 = vector.extract_strided_slice %1 {offsets = [0, 3, 0], sizes = [20, 16, 8], strides = [1, 1, 1]} : vector<20x20x8xf32> to vector<20x16x8xf32>
    %8 = arith.maximumf %6, %7 : vector<20x16x8xf32>
    %9 = vector.extract_strided_slice %1 {offsets = [0, 4, 0], sizes = [20, 16, 8], strides = [1, 1, 1]} : vector<20x20x8xf32> to vector<20x16x8xf32>
    %10 = arith.maximumf %8, %9 : vector<20x16x8xf32>
    %11 = vector.extract_strided_slice %10 {offsets = [0, 0, 0], sizes = [16, 16, 8], strides = [1, 1, 1]} : vector<20x16x8xf32> to vector<16x16x8xf32>
    %12 = vector.extract_strided_slice %10 {offsets = [1, 0, 0], sizes = [16, 16, 8], strides = [1, 1, 1]} : vector<20x16x8xf32> to vector<16x16x8xf32>
    %13 = arith.maximumf %11, %12 : vector<16x16x8xf32>
    %14 = vector.extract_strided_slice %10 {offsets = [2, 0, 0], sizes = [16, 16, 8], strides = [1, 1, 1]} : vector<20x16x8xf32> to vector<16x16x8xf32>
    %15 = arith.maximumf %13, %14 : vector<16x16x8xf32>
    %16 = vector.extract_strided_slice %10 {offsets = [3, 0, 0], sizes = [16, 16, 8], strides = [1, 1, 1]} : vector<20x16x8xf32> to vector<16x16x8xf32>
    %17 = arith.maximumf %15, %16 : vector<16x16x8xf32>
    %18 = vector.extract_strided_slice %10 {offsets = [4, 0, 0], sizes = [16, 16, 8], strides = [1, 1, 1]} : vector<20x16x8xf32> to vector<16x16x8xf32>
    %19 = arith.maximumf %17, %18 : vector<16x16x8xf32>
    %20 = vector.shape_cast %19 : vector<16x16x8xf32> to vector<1x16x16x8xf32>
    %cst = arith.constant dense<0.000000e+00> : vector<1xf32>
    %21 = vector.multi_reduction <add>, %20, %cst [1, 2, 3] : vector<1x16x16x8xf32> to vector<1xf32>
    %22 = vector.shape_cast %21 : vector<1xf32> to vector<1x1x1x1xf32>
    %23 = vector.extract %22[0, 0, 0, 0] : f32 from vector<1x1x1x1xf32>
    %24 = vector.broadcast %23 : f32 to vector<1x8x128xf32>
    %c0_2 = arith.constant 0 : index
    %c0_3 = arith.constant 0 : index
    %c0_4 = arith.constant 0 : index
    %25 = vector.load %arg2[%c0_2, %c0_3, %c0_4] : memref<1x8x128xf32, #tpu.memory_space<vmem>>, vector<1x8x128xf32>
    tpu.vector_store %arg2[%c0_2, %c0_3, %c0_4], %24 {strides = array<i32>} : memref<1x8x128xf32, #tpu.memory_space<vmem>>, vector<1x8x128xf32>,
    return
  }
  func.func @transform_0(%arg0: i32) -> (i32, i32, i32) {
    %c0_i32 = arith.constant 0 : i32
    %c0_i32_0 = arith.constant 0 : i32
    %c0_i32_1 = arith.constant 0 : i32
    return %c0_i32, %c0_i32_0, %arg0 : i32, i32, i32
  }
  func.func @transform_1(%arg0: i32) -> (i32, i32, i32) {
    %c0_i32 = arith.constant 0 : i32
    %c0_i32_0 = arith.constant 0 : i32
    %c0_i32_1 = arith.constant 0 : i32
    return %arg0, %c0_i32, %c0_i32_0 : i32, i32, i32
  }
}

</mosaic_0001>

<bundles_post_ra>
// kernel: tpu_custom_call.1
= control target key start
LH: loop header
LB: loop body
LE: loop exit
PB: predicated region body
PF: predicated region fallthrough
CT: control target
= control target key end

     0   :  { %6 = vsyncpa [#allocation3], 0  ;;  %vm189_vm0 = vcmask 1046528   ;;  %vm370_vm1 = vcmask 1045504   ;;  %vm551_vm2 = vcmask 1044480   ;;  %vm732_vm3 = vcmask 1043456   ;;  %s2659_s0 = inlined_call_operand.vmem [shape: bf16[20,20,8], index: 0, kind: input, shape index: {}]   ;;  %s2660_s1 = inlined_call_operand.hbm [shape: f32[1,8,128], index: 1, kind: output, shape index: {}]  }
   0x1   :  { %v1131_v0 = vld [vmem:[%s2659_s0] sm:$0xff]   ;;  %v11_v1 = vld [vmem:[%s2659_s0 + $0x8] sm:$0x3]  ;;  %v12_v2 = vld [vmem:[%s2659_s0 + $0xc] sm:$0xff]   ;;  %vm1041_vm4 = vcmask 64512  }
   0x2   :  { %v1170_v3 = vld [vmem:[%s2659_s0 + $0x18] sm:$0xff]   ;;  %v14_v4 = vld [vmem:[%s2659_s0 + $0x14] sm:$0x3]  ;;  %v17_v5 = vld [vmem:[%s2659_s0 + $0x20] sm:$0x3]  ;;  %v1236_v7 = vunpack.c.l.bf16 %v1131_v0  ;;  %v1238_v8 = vunpack.c.h.bf16 %v1131_v0  ;;  %v1259_v16 = vunpack.c.l.bf16 %v11_v1  ;;  %v1261_v17 = vunpack.c.l.bf16 %v12_v2 }
   0x3   :  { %v18_v6 = vld [vmem:[%s2659_s0 + $0x24] sm:$0xff]   ;;  %v20_v9 = vld [vmem:[%s2659_s0 + $0x2c] sm:$0x3]  ;;  %v1171_v10 = vld [vmem:[%s2659_s0 + $0x30] sm:$0xff]   ;;  %v1246_v11 = vunpack.c.l.bf16 %v1170_v3  ;;  %v1248_v12 = vunpack.c.h.bf16 %v1170_v3  ;;  %v1269_v20 = vunpack.c.h.bf16 %v12_v2  ;;  %v1271_v21 = vunpack.c.l.bf16 %v14_v4 }
   0x4   :  { %2936 = vst [vmem:[#allocation5_spill] sm:$0xff] %v1236_v7  ;;  %2937 = vst [vmem:[#allocation6_spill] sm:$0xff] %v1238_v8  ;;  %v23_v13 = vld [vmem:[%s2659_s0 + $0x38] sm:$0x3]  ;;  %v24_v14 = vld [vmem:[%s2659_s0 + $0x3c] sm:$0xff]   ;;  %v1273_v22 = vunpack.c.l.bf16 %v17_v5  ;;  %v1275_v23 = vunpack.c.l.bf16 %v18_v6  ;;  %v1277_v24 = vunpack.c.l.bf16 %v1171_v10  ;;  %v1279_v25 = vunpack.c.h.bf16 %v1171_v10 }
   0x5   :  { %2938 = vst [vmem:[#allocation7_spill] sm:$0xff] %v1246_v11  ;;  %2939 = vst [vmem:[#allocation8_spill] sm:$0xff] %v1248_v12  ;;  %v1172_v15 = vld [vmem:[%s2659_s0 + $0x48] sm:$0xff]   ;;  %v26_v18 = vld [vmem:[%s2659_s0 + $0x44] sm:$0x3]  ;;  %v1290_v29 = vunpack.c.h.bf16 %v18_v6  ;;  %v1292_v30 = vunpack.c.l.bf16 %v20_v9  ;;  %v1307_v36 = vunpack.c.l.bf16 %v23_v13  ;;  %v1309_v37 = vunpack.c.l.bf16 %v24_v14 }
   0x6   :  { %2940 = vst [vmem:[#allocation9_spill] sm:$0xff] %v1259_v16  ;;  %2941 = vst [vmem:[#allocation10_spill] sm:$0xff] %v1261_v17  ;;  %v1173_v19 = vld [vmem:[%s2659_s0 + $0x60] sm:$0xff]   ;;  %v29_v26 = vld [vmem:[%s2659_s0 + $0x50] sm:$0x3]  ;;  %v1294_v31 = vunpack.c.l.bf16 %v1172_v15  ;;  %v1296_v32 = vunpack.c.h.bf16 %v1172_v15  ;;  %v1321_v42 = vunpack.c.h.bf16 %v24_v14  ;;  %v1323_v43 = vunpack.c.l.bf16 %v26_v18 }
   0x7   :  { %2942 = vst [vmem:[#allocation11_spill] sm:$0xff] %v1269_v20  ;;  %2943 = vst [vmem:[#allocation12_spill] sm:$0xff] %v1271_v21  ;;  %v30_v27 = vld [vmem:[%s2659_s0 + $0x54] sm:$0xff]   ;;  %v32_v28 = vld [vmem:[%s2659_s0 + $0x5c] sm:$0x3]  ;;  %v1311_v38 = vunpack.c.l.bf16 %v1173_v19  ;;  %v1313_v39 = vunpack.c.h.bf16 %v1173_v19  ;;  %v1334_v47 = vunpack.c.l.bf16 %v29_v26 }
   0x8   :  { %2944 = vst [vmem:[#allocation13_spill] sm:$0xff] %v1273_v22  ;;  %2945 = vst [vmem:[#allocation14_spill] sm:$0xff] %v1275_v23  ;;  %v35_v33 = vld [vmem:[%s2659_s0 + $0x68] sm:$0x3]  ;;  %v36_v34 = vld [vmem:[%s2659_s0 + $0x6c] sm:$0xff]   ;;  %v1336_v48 = vunpack.c.l.bf16 %v30_v27  ;;  %v1338_v49 = vunpack.c.h.bf16 %v30_v27  ;;  %v1340_v50 = vunpack.c.l.bf16 %v32_v28 }
   0x9   :  { %2946 = vst [vmem:[#allocation15_spill] sm:$0xff] %v1277_v24  ;;  %2947 = vst [vmem:[#allocation16_spill] sm:$0xff] %v1279_v25  ;;  %v1174_v35 = vld [vmem:[%s2659_s0 + $0x78] sm:$0xff]   ;;  %v38_v40 = vld [vmem:[%s2659_s0 + $0x74] sm:$0x3]  ;;  %v1355_v56 = vunpack.c.l.bf16 %v35_v33  ;;  %v1357_v57 = vunpack.c.l.bf16 %v36_v34  ;;  %v1369_v62 = vunpack.c.h.bf16 %v36_v34 }
   0xa   :  { %2948 = vst [vmem:[#allocation17_spill] sm:$0xff] %v1290_v29  ;;  %2949 = vst [vmem:[#allocation18_spill] sm:$0xff] %v1292_v30  ;;  %v1175_v41 = vld [vmem:[%s2659_s0 + $0x90] sm:$0xff]   ;;  %v41_v44 = vld [vmem:[%s2659_s0 + $0x80] sm:$0x3]  ;;  %v1342_v51 = vunpack.c.l.bf16 %v1174_v35  ;;  %v1344_v52 = vunpack.c.h.bf16 %v1174_v35  ;;  %v1371_v63 = vunpack.c.l.bf16 %v38_v40 }
   0xb   :  { %2950 = vst [vmem:[#allocation19_spill] sm:$0xff] %v1294_v31  ;;  %2951 = vst [vmem:[#allocation20_spill] sm:$0xff] %v1296_v32  ;;  %v42_v45 = vld [vmem:[%s2659_s0 + $0x84] sm:$0xff]   ;;  %v44_v53 = vld [vmem:[%s2659_s0 + $0x8c] sm:$0x3]  ;;  %v1359_v58 = vunpack.c.l.bf16 %v1175_v41  ;;  %v1361_v59 = vunpack.c.h.bf16 %v1175_v41  ;;  %v1386_v5 = vunpack.c.l.bf16 %v41_v44 }
   0xc   :  { %2952 = vst [vmem:[#allocation21_spill] sm:$0xff] %v1307_v36  ;;  %2953 = vst [vmem:[#allocation22_spill] sm:$0xff] %v1309_v37  ;;  %v1176_v46 = vld [vmem:[%s2659_s0 + $0xa8] sm:$0xff]   ;;  %v47_v54 = vld [vmem:[%s2659_s0 + $0x98] sm:$0x3]  ;;  %v1388_v6 = vunpack.c.l.bf16 %v42_v45  ;;  %v1399_v14 = vunpack.c.h.bf16 %v42_v45  ;;  %v1401_v15 = vunpack.c.l.bf16 %v44_v53 }
   0xd   :  { %2954 = vst [vmem:[#allocation23_spill] sm:$0xff] %v1311_v38  ;;  %2955 = vst [vmem:[#allocation24_spill] sm:$0xff] %v1313_v39  ;;  %v48_v55 = vld [vmem:[%s2659_s0 + $0x9c] sm:$0xff]   ;;  %v50_v60 = vld [vmem:[%s2659_s0 + $0xa4] sm:$0x3]  ;;  %v1373_v0 = vunpack.c.l.bf16 %v1176_v46  ;;  %v1375_v1 = vunpack.c.h.bf16 %v1176_v46  ;;  %v1403_v18 = vunpack.c.l.bf16 %v47_v54 }
   0xe   :  { %2956 = vst [vmem:[#allocation25_spill] sm:$0xff] %v1321_v42  ;;  %2957 = vst [vmem:[#allocation26_spill] sm:$0xff] %v1323_v43  ;;  %v1177_v61 = vld [vmem:[%s2659_s0 + $0xc0] sm:$0xff]   ;;  %v53_v2 = vld [vmem:[%s2659_s0 + $0xb0] sm:$0x3]  ;;  %v1405_v19 = vunpack.c.l.bf16 %v48_v55  ;;  %v1420_v35 = vunpack.c.h.bf16 %v48_v55  ;;  %v1422_v40 = vunpack.c.l.bf16 %v50_v60 }
   0xf   :  { %2958 = vst [vmem:[#allocation27_spill] sm:$0xff] %v1334_v47  ;;  %2959 = vst [vmem:[#allocation28_spill] sm:$0xff] %v1336_v48  ;;  %v54_v3 = vld [vmem:[%s2659_s0 + $0xb4] sm:$0xff]   ;;  %v56_v9 = vld [vmem:[%s2659_s0 + $0xbc] sm:$0x3]  ;;  %v1407_v26 = vunpack.c.l.bf16 %v1177_v61  ;;  %v1409_v27 = vunpack.c.h.bf16 %v1177_v61  ;;  %v1428_v45 = vunpack.c.l.bf16 %v53_v2  ;;  %v190_v2 = vrot.slane %v1236_v7, 1 }
  0x10   :  { %2960 = vst [vmem:[#allocation29_spill] sm:$0xff] %v1338_v49  ;;  %2961 = vst [vmem:[#allocation30_spill] sm:$0xff] %v1340_v50  ;;  %v1178_v4 = vld [vmem:[%s2659_s0 + $0xd8] sm:$0xff]   ;;  %v59_v10 = vld [vmem:[%s2659_s0 + $0xc8] sm:$0x3]  ;;  %v1430_v46 = vunpack.c.l.bf16 %v54_v3  ;;  %v1432_v53 = vunpack.c.h.bf16 %v54_v3  ;;  %v1434_v54 = vunpack.c.l.bf16 %v56_v9  ;;  %v193_v3 = vrot.slane %v1259_v16, 1 }
  0x11   :  { %2962 = vst [vmem:[#allocation31_spill] sm:$0xff] %v1342_v51  ;;  %2963 = vst [vmem:[#allocation32_spill] sm:$0xff] %v1344_v52  ;;  %v60_v13 = vld [vmem:[%s2659_s0 + $0xcc] sm:$0xff]   ;;  %v62_v28 = vld [vmem:[%s2659_s0 + $0xd4] sm:$0x3]  ;;  %v1424_v41 = vunpack.c.l.bf16 %v1178_v4  ;;  %v1426_v44 = vunpack.c.h.bf16 %v1178_v4  ;;  %v1436_v61 = vunpack.c.l.bf16 %v59_v10  ;;  %v195_v9 = vrot.slane %v1261_v17, 1 }
  0x12   :  { %2964 = vst [vmem:[#allocation33_spill] sm:$0xff] %v1355_v56  ;;  %2965 = vst [vmem:[#allocation34_spill] sm:$0xff] %v1357_v57  ;;  %v65_v33 = vld [vmem:[%s2659_s0 + $0xe0] sm:$0x3]  ;;  %v66_v34 = vld [vmem:[%s2659_s0 + $0xe4] sm:$0xff]   ;;  %v1440_v55 = vunpack.c.h.bf16 %v60_v13  ;;  %v1442_v60 = vunpack.c.l.bf16 %v62_v28  ;;  %v198_v28 = vrot.slane %v1271_v21, 1 }
  0x13   :  { %2966 = vst [vmem:[#allocation35_spill] sm:$0xff] %v1359_v58  ;;  %2967 = vst [vmem:[#allocation36_spill] sm:$0xff] %v1361_v59  ;;  %v1446_v4 = vunpack.c.l.bf16 %v66_v34  ;;  %v68_v10 = vld [vmem:[%s2659_s0 + $0xec] sm:$0x3]  ;;  %v203_v7 = vrot.slane %v1273_v22, 1  ;;  %v206_v16 = vrot.slane %v1290_v29, 1 }
  0x14   :  { %2968 = vst [vmem:[#allocation37_spill] sm:$0xff] %v1369_v62  ;;  %2969 = vst [vmem:[#allocation38_spill] sm:$0xff] %v1371_v63  ;;  %v208_v17 = vrot.slane %v1292_v30, 1  ;;  %v213_v21 = vrot.slane %v1307_v36, 1  ;;  %v215_v22 = vrot.slane %v1309_v37, 1  ;;  %s1204_s0 = smov [#allocation2]  }
  0x15   :  { %2970 = vst [vmem:[#allocation39_spill] sm:$0xff] %v1373_v0  ;;  %2971 = vst [vmem:[#allocation40_spill] sm:$0xff] %v1375_v1  ;;  %s1122_s28 = sshll.u32 %s1204_s0, 4  ;;  %s1123_s28 = int_to_ptr.vmem [resolvable:$true] %s1122_s28 }
  0x16   :  { %2972 = vst [vmem:[#allocation41_spill] sm:$0xff] %v1386_v5  ;;  %2973 = vst [vmem:[#allocation42_spill] sm:$0xff] %v1388_v6  ;;  %s1182_s30 = scalar_lea.vmem %s1123_s28, 128  ;;  %p1187_p1 = scmp.lt.s32.totalorder %s1123_s28, %s1123_s28 }
  0x17   :  { %2974 = vst [vmem:[#allocation43_spill] sm:$0xff] %v1399_v14  ;;  %2975 = vst [vmem:[#allocation44_spill] sm:$0xff] %v1401_v15  ;;  %p1183_p0 = scmp.ne.s32.totalorder %s1123_s28, %s1182_s30  ;;  %p1188_p2 = scmp.lt.s32.totalorder %s1182_s30, %s1182_s30 }
  0x18   :  { %2976 = vst [vmem:[#allocation45_spill] sm:$0xff] %v1403_v18  ;;  %2977 = vst [vmem:[#allocation46_spill] sm:$0xff] %v1405_v19 }
  0x19   :  { %2978 = vst [vmem:[#allocation47_spill] sm:$0xff] %v1407_v26  ;;  %2979 = vst [vmem:[#allocation48_spill] sm:$0xff] %v1409_v27  ;;  %v1438_v27 = vunpack.c.l.bf16 %v60_v13  ;;  %v1444_v26 = vunpack.c.l.bf16 %v65_v33  ;;  %v196_v13 = vrot.slane %v1269_v20, 1  ;;  %v200_v33 = vrot.slane %v1246_v11, 1  ;;  %p1189_p3 = por %p1188_p2, %p1187_p1 }
  0x1a   :  { %2980 = vst [vmem:[#allocation49_spill] sm:$0xff] %v1420_v35  ;;  %2981 = vst [vmem:[#allocation50_spill] sm:$0xff] %v1422_v40  ;;  %v211_v20 = vrot.slane %v1279_v25, 1 }
  0x1b   :  { %2982 = vst [vmem:[#allocation51_spill] sm:$0xff] %v1424_v41  ;;  %2983 = vst [vmem:[#allocation52_spill] sm:$0xff] %v1426_v44  ;;  %v191_v44 = vrot.slane %v1238_v8, 1  ;;  %v205_v8 = vrot.slane %v1275_v23, 1  ;;  %v210_v41 = vrot.slane %v1277_v24, 1  ;;  %v216_v23 = vrot.slane %v1321_v42, 1  ;;  %p1190_p4 = pnand %p1189_p3, %p1183_p0 }
  0x1c   :  { %2984 = vst [vmem:[#allocation53_spill] sm:$0xff] %v1428_v45  ;;  %2985 = vst [vmem:[#allocation54_spill] sm:$0xff] %v1430_v46  ;;  %v1482_v30 = vsel %vm189_vm0, %v196_v13, %v198_v28  ;;  %v1494_v42 = vsel %vm189_vm0, %v206_v16, %v208_v17  ;;  %v221_v28 = vrot.slane %v1296_v32, 1  ;;  %v226_v17 = vrot.slane %v1338_v49, 1 }
  0x1d   :  { %2986 = vst [vmem:[#allocation55_spill] sm:$0xff] %v1432_v53  ;;  %2987 = vst [vmem:[#allocation56_spill] sm:$0xff] %v1434_v54  ;;  %v1476_v29 = vsel %vm189_vm0, %v191_v44, %v193_v3  ;;  %v1498_v3 = vsel %vm189_vm0, %v210_v41, %v211_v20  ;;  %v230_v41 = vrot.slane %v1311_v38, 1  ;;  %v243_v49 = vrot.slane %v1386_v5, 1 }
  0x1e   :  { %2988 = vst [vmem:[#allocation57_spill] sm:$0xff] %v1436_v61  ;;  %2989 = vst [vmem:[#allocation58_spill] sm:$0xff] %v1438_v27  ;;  %v246_v38 = vrot.slane %v1399_v14, 1  ;;  %v251_v14 = vrot.slane %v1361_v59, 1 }
  0x1f   :  { %2990 = vst [vmem:[#allocation59_spill] sm:$0xff] %v1440_v55  ;;  %2991 = vst [vmem:[#allocation60_spill] sm:$0xff] %v1442_v60  ;;  %v1468_v60 = vunpack.c.l.bf16 %v68_v10 }
  0x20   :  { %2992 = vst [vmem:[#allocation61_spill] sm:$0xff] %v1444_v26  ;;  %2993 = vst [vmem:[#allocation62_spill] sm:$0xff] %v1446_v4  ;;  %v201_v4 = vrot.slane %v1248_v12, 1  ;;  %v1463_v26 = vunpack.c.h.bf16 %v66_v34  ;;  %v1471_v12 = vsel %vm189_vm0, %v190_v2, %v191_v44  ;;  %v1479_v34 = vsel %vm189_vm0, %v195_v9, %v196_v13 }
  0x21   :  { %2995 = vst [vmem:[#allocation64_spill] sm:$0xff] %v1468_v60  ;;  %2996 = vst [vmem:[#allocation65_spill] sm:$0xff] %v1471_v12  ;;  %v1491_v2 = vsel %vm189_vm0, %v205_v8, %v206_v16  ;;  %v218_v44 = vrot.slane %v1323_v43, 1  ;;  %v1501_v9 = vsel %vm189_vm0, %v211_v20, %v213_v21  ;;  %v220_v13 = vrot.slane %v1294_v31, 1  ;;  %v3044_v12 = vld [vmem:[#allocation17_spill] sm:$0xff] }
  0x22   :  { %2994 = vst [vmem:[#allocation63_spill] sm:$0xff] %v1463_v26  ;;  %2997 = vst [vmem:[#allocation66_spill] sm:$0xff] %v1476_v29  ;;  %v1485_v36 = vsel %vm189_vm0, %v200_v33, %v201_v4  ;;  %v1488_v10 = vsel %vm189_vm0, %v201_v4, %v203_v7  ;;  %v1506_v7 = vsel %vm189_vm0, %v215_v22, %v216_v23  ;;  %v223_v8 = vrot.slane %v1334_v47, 1  ;;  %v3021_v59 = vld [vmem:[#allocation51_spill] sm:$0xff] }
  0x23   :  { %2998 = vst [vmem:[#allocation67_spill] sm:$0xff] %v1488_v10  ;;  %2999 = vst [vmem:[#allocation68_spill] sm:$0xff] %v1491_v2  ;;  %v225_v16 = vrot.slane %v1336_v48, 1  ;;  %v228_v4 = vrot.slane %v1340_v50, 1  ;;  %v231_v20 = vrot.slane %v1313_v39, 1  ;;  %v233_v21 = vrot.slane %v1355_v56, 1 }
  0x24   :  { %3000 = vst [vmem:[#allocation69_spill] sm:$0xff] %v1494_v42  ;;  %3001 = vst [vmem:[#allocation70_spill] sm:$0xff] %v1498_v3  ;;  %v235_v33 = vrot.slane %v1357_v57, 1  ;;  %v236_v43 = vrot.slane %v1369_v62, 1  ;;  %v238_v22 = vrot.slane %v1371_v63, 1  ;;  %v240_v47 = vrot.slane %v1342_v51, 1 }
  0x25   :  { %3002 = vst [vmem:[#allocation71_spill] sm:$0xff] %v1501_v9  ;;  %3003 = vst [vmem:[#allocation72_spill] sm:$0xff] %v1506_v7  ;;  %v241_v48 = vrot.slane %v1344_v52, 1  ;;  %v245_v50 = vrot.slane %v1388_v6, 1  ;;  %v1524_v39 = vsel %vm189_vm0, %v216_v23, %v218_v44  ;;  %v1527_v56 = vsel %vm189_vm0, %v220_v13, %v221_v28  ;;  %v3046_v2 = vld [vmem:[#allocation28_spill] sm:$0xff]  ;;  %v3047_v3 = vld [vmem:[#allocation29_spill] sm:$0xff] }
  0x26   :  { %3004 = vst [vmem:[#allocation73_spill] sm:$0xff] %v1524_v39  ;;  %3005 = vst [vmem:[#allocation74_spill] sm:$0xff] %v1527_v56  ;;  %v1530_v62 = vsel %vm189_vm0, %v221_v28, %v223_v8  ;;  %v248_v63 = vrot.slane %v1401_v15, 1  ;;  %v1534_v51 = vsel %vm189_vm0, %v225_v16, %v226_v17  ;;  %v1537_v5 = vsel %vm189_vm0, %v226_v17, %v228_v4  ;;  %v3019_v15 = vld [vmem:[#allocation48_spill] sm:$0xff]  ;;  %v3048_v9 = vld [vmem:[#allocation23_spill] sm:$0xff] }
  0x27   :  { %3006 = vst [vmem:[#allocation75_spill] sm:$0xff] %v1530_v62  ;;  %3007 = vst [vmem:[#allocation76_spill] sm:$0xff] %v1534_v51  ;;  %v250_v6 = vrot.slane %v1359_v58, 1  ;;  %v1542_v23 = vsel %vm189_vm0, %v230_v41, %v231_v20  ;;  %v1545_v44 = vsel %vm189_vm0, %v231_v20, %v233_v21  ;;  %v1548_v13 = vsel %vm189_vm0, %v235_v33, %v236_v43  ;;  %v3022_v58 = vld [vmem:[#allocation52_spill] sm:$0xff]  ;;  %v3050_v56 = vld [vmem:[#allocation37_spill] sm:$0xff] }
  0x28   :  { %3008 = vst [vmem:[#allocation77_spill] sm:$0xff] %v1537_v5  ;;  %3009 = vst [vmem:[#allocation78_spill] sm:$0xff] %v1542_v23  ;;  %v1551_v28 = vsel %vm189_vm0, %v236_v43, %v238_v22  ;;  %v1554_v8 = vsel %vm189_vm0, %v240_v47, %v241_v48  ;;  %v1557_v16 = vsel %vm189_vm0, %v241_v48, %v243_v49  ;;  %v253_v4 = vrot.slane %v1403_v18, 1  ;;  %v3018_v22 = vld [vmem:[#allocation47_spill] sm:$0xff]  ;;  %v3049_v7 = vld [vmem:[#allocation24_spill] sm:$0xff] }
  0x29   :  { %3010 = vst [vmem:[#allocation79_spill] sm:$0xff] %v1545_v44  ;;  %3011 = vst [vmem:[#allocation80_spill] sm:$0xff] %v1548_v13  ;;  %v1560_v17 = vsel %vm189_vm0, %v245_v50, %v246_v38  ;;  %v1564_v41 = vsel %vm189_vm0, %v246_v38, %v248_v63  ;;  %v255_v20 = vrot.slane %v1405_v19, 1  ;;  %v256_v21 = vrot.slane %v1420_v35, 1  ;;  %v3020_v19 = vld [vmem:[#allocation60_spill] sm:$0xff]  ;;  %v3055_v42 = vld [vmem:[#allocation35_spill] sm:$0xff] }
  0x2a   :  { %3012 = vst [vmem:[#allocation81_spill] sm:$0xff] %v1551_v28  ;;  %3013 = vst [vmem:[#allocation82_spill] sm:$0xff] %v1554_v8  ;;  %v258_v43 = vrot.slane %v1422_v40, 1  ;;  %v1570_v47 = vsel %vm189_vm0, %v250_v6, %v251_v14  ;;  %v260_v48 = vrot.slane %v1373_v0, 1  ;;  %v261_v49 = vrot.slane %v1375_v1, 1  ;;  %v3057_v51 = vld [vmem:[#allocation46_spill] sm:$0xff] }
  0x2b   :  { %3014 = vst [vmem:[#allocation83_spill] sm:$0xff] %v1557_v16  ;;  %3015 = vst [vmem:[#allocation84_spill] sm:$0xff] %v1560_v17  ;;  %v263_v50 = vrot.slane %v1428_v45, 1  ;;  %v265_v33 = vrot.slane %v1430_v46, 1  ;;  %v266_v38 = vrot.slane %v1432_v53, 1  ;;  %v268_v63 = vrot.slane %v1434_v54, 1 }
  0x2c   :  { %3016 = vst [vmem:[#allocation85_spill] sm:$0xff] %v1564_v41  ;;  %3017 = vst [vmem:[#allocation86_spill] sm:$0xff] %v1570_v47  ;;  %v270_v18 = vrot.slane %v3018_v22, 1  ;;  %v271_v35 = vrot.slane %v3019_v15, 1  ;;  %v273_v40 = vrot.slane %v1436_v61, 1  ;;  %v275_v6 = vrot.slane %v1438_v27, 1 }
  0x2d   :  { %v276_v0 = vrot.slane %v1440_v55, 1  ;;  %v278_v1 = vrot.slane %v3020_v19, 1  ;;  %v280_v45 = vrot.slane %v3021_v59, 1  ;;  %v281_v46 = vrot.slane %v3022_v58, 1  ;;  %v3023_v47 = vld [vmem:[#allocation61_spill] sm:$0xff]  ;;  %v3026_v15 = vld [vmem:[#allocation62_spill] sm:$0xff] }
  0x2e   :  { %v283_v53 = vrot.slane %v3023_v47, 1  ;;  %v1588_v54 = vsel %vm189_vm0, %v251_v14, %v253_v4  ;;  %v1591_v22 = vsel %vm189_vm0, %v255_v20, %v256_v21  ;;  %v285_v61 = vrot.slane %v3026_v15, 1  ;;  %v3058_v8 = vld [vmem:[#allocation49_spill] sm:$0xff]  ;;  %v3059_v16 = vld [vmem:[#allocation39_spill] sm:$0xff]  ;;  %v3062_v13 = vld [vmem:[#allocation54_spill] sm:$0xff] }
  0x2f   :  { %3024 = vst [vmem:[#allocation87_spill] sm:$0xff] %v1588_v54  ;;  %3025 = vst [vmem:[#allocation88_spill] sm:$0xff] %v1591_v22  ;;  %v286_v27 = vrot.slane %v1463_v26, 1  ;;  %v1596_v55 = vsel %vm189_vm0, %v256_v21, %v258_v43  ;;  %v1599_v19 = vsel %vm189_vm0, %v260_v48, %v261_v49  ;;  %v1602_v58 = vsel %vm189_vm0, %v261_v49, %v263_v50  ;;  %v3063_v23 = vld [vmem:[#allocation55_spill] sm:$0xff] }
  0x30   :  { %3027 = vst [vmem:[#allocation89_spill] sm:$0xff] %v1596_v55  ;;  %3028 = vst [vmem:[#allocation90_spill] sm:$0xff] %v1599_v19  ;;  %v288_v47 = vrot.slane %v1468_v60, 1  ;;  %v1606_v14 = vsel %vm189_vm0, %v265_v33, %v266_v38  ;;  %v1609_v4 = vsel %vm189_vm0, %v266_v38, %v268_v63  ;;  %v1612_v20 = vsel %vm189_vm0, %v270_v18, %v271_v35  ;;  %v3038_v18 = vld [vmem:[#allocation5_spill] sm:$0xff]  ;;  %v3040_v63 = vld [vmem:[#allocation10_spill] sm:$0xff] }
  0x31   :  { %3029 = vst [vmem:[#allocation91_spill] sm:$0xff] %v1602_v58  ;;  %3030 = vst [vmem:[#allocation92_spill] sm:$0xff] %v1606_v14  ;;  %v1615_v21 = vsel %vm189_vm0, %v271_v35, %v273_v40  ;;  %v1618_v43 = vsel %vm189_vm0, %v275_v6, %v276_v0  ;;  %v1621_v48 = vsel %vm189_vm0, %v276_v0, %v278_v1  ;;  %v3039_v35 = vld [vmem:[#allocation6_spill] sm:$0xff]  ;;  %v3041_v1 = vld [vmem:[#allocation11_spill] sm:$0xff]  ;;  %v466_v29 = vrot.slane %v3026_v15, 2 }
  0x32   :  { %3031 = vst [vmem:[#allocation93_spill] sm:$0xff] %v1609_v4  ;;  %3032 = vst [vmem:[#allocation94_spill] sm:$0xff] %v1612_v20  ;;  %v1624_v49 = vsel %vm189_vm0, %v280_v45, %v281_v46  ;;  %v1627_v50 = vsel %vm189_vm0, %v281_v46, %v283_v53  ;;  %v287_v33 = vsel %vm189_vm0, %v285_v61, %v286_v27  ;;  %v3042_v53 = vld [vmem:[#allocation8_spill] sm:$0xff]  ;;  %v467_v6 = vrot.slane %v1463_v26, 2  ;;  %v3045_v38 = vld [vmem:[#allocation25_spill] sm:$0xff] }
  0x33   :  { %3033 = vst [vmem:[#allocation95_spill] sm:$0xff] %v1615_v21  ;;  %3034 = vst [vmem:[#allocation96_spill] sm:$0xff] %v1618_v43  ;;  %v289_v0 = vsel %vm189_vm0, %v286_v27, %v288_v47  ;;  %v469_v61 = vrot.slane %v1468_v60, 2  ;;  %v368_v45 = vmax.f32 %v3026_v15, %v287_v33  ;;  %v3051_v47 = vld [vmem:[#allocation31_spill] sm:$0xff]  ;;  %v3052_v60 = vld [vmem:[#allocation42_spill] sm:$0xff]  ;;  %v371_v54 = vrot.slane %v3038_v18, 2 }
  0x34   :  { %3035 = vst [vmem:[#allocation97_spill] sm:$0xff] %v1621_v48  ;;  %3036 = vst [vmem:[#allocation98_spill] sm:$0xff] %v1624_v49  ;;  %v369_v62 = vmax.f32 %v1463_v26, %v289_v0  ;;  %v468_v27 = vsel %vm370_vm1, %v466_v29, %v467_v6  ;;  %v3053_v40 = vld [vmem:[#allocation43_spill] sm:$0xff]  ;;  %v3056_v0 = vld [vmem:[#allocation36_spill] sm:$0xff]  ;;  %v372_v46 = vrot.slane %v3039_v35, 2  ;;  %v376_v44 = vrot.slane %v3040_v63, 2 }
  0x35   :  { %3037 = vst [vmem:[#allocation99_spill] sm:$0xff] %v1627_v50  ;;  %v3043_v50 = vld [vmem:[#allocation14_spill] sm:$0xff]  ;;  %v470_v33 = vsel %vm370_vm1, %v467_v6, %v469_v61  ;;  %v3060_v6 = vld [vmem:[#allocation40_spill] sm:$0xff]  ;;  %v1698_v17 = vmax.f32 %v368_v45, %v468_v27  ;;  %v3065_v55 = vld [vmem:[#allocation9_spill] sm:$0xff]  ;;  %v377_v61 = vrot.slane %v3041_v1, 2  ;;  %v382_v28 = vrot.slane %v3042_v53, 2 }
  0x36   :  { %v1705_v5 = vmax.f32 %v369_v62, %v470_v33  ;;  %v374_v22 = vrot.slane %v3065_v55, 2  ;;  %v3066_v45 = vld [vmem:[#allocation12_spill] sm:$0xff]  ;;  %v3067_v14 = vld [vmem:[#allocation13_spill] sm:$0xff]  ;;  %v3068_v4 = vld [vmem:[#allocation47_spill] sm:$0xff]  ;;  %v386_v55 = vrot.slane %v3043_v50, 2  ;;  %v387_v58 = vrot.slane %v3044_v12, 2 }
  0x37   :  { %3061 = vst [vmem:[#allocation14_spill] sm:$0xff] %v1698_v17  ;;  %v379_v27 = vrot.slane %v3066_v45, 2  ;;  %v381_v17 = vrot.slane %v1246_v11, 2  ;;  %v384_v29 = vrot.slane %v3067_v14, 2  ;;  %v3069_v33 = vld [vmem:[#allocation48_spill] sm:$0xff]  ;;  %v3070_v19 = vld [vmem:[#allocation58_spill] sm:$0xff]  ;;  %v1737_v12 = vsel %vm370_vm1, %v376_v44, %v377_v61 }
  0x38   :  { %3064 = vst [vmem:[#allocation100_spill] sm:$0xff] %v1705_v5  ;;  %v3071_v45 = vld [vmem:[#allocation59_spill] sm:$0xff]  ;;  %v3072_v14 = vld [vmem:[#allocation18_spill] sm:$0xff]  ;;  %v3074_v62 = vld [vmem:[#allocation52_spill] sm:$0xff]  ;;  %v1731_v5 = vsel %vm370_vm1, %v371_v54, %v372_v46  ;;  %v1734_v21 = vsel %vm370_vm1, %v372_v46, %v374_v22  ;;  %v391_v20 = vrot.slane %v1277_v24, 2  ;;  %v1750_v54 = vsel %vm370_vm1, %v386_v55, %v387_v58 }
  0x39   :  { %v389_v15 = vrot.slane %v3072_v14, 2  ;;  %v1740_v41 = vsel %vm370_vm1, %v377_v61, %v379_v27  ;;  %v1743_v39 = vsel %vm370_vm1, %v381_v17, %v382_v28  ;;  %v1746_v26 = vsel %vm370_vm1, %v382_v28, %v384_v29  ;;  %v3075_v46 = vld [vmem:[#allocation21_spill] sm:$0xff]  ;;  %v3076_v27 = vld [vmem:[#allocation26_spill] sm:$0xff]  ;;  %v3077_v14 = vld [vmem:[#allocation27_spill] sm:$0xff] }
  0x3a   :  { %v392_v22 = vrot.slane %v1279_v25, 2  ;;  %v394_v10 = vrot.slane %v3075_v46, 2  ;;  %v396_v44 = vrot.slane %v1309_v37, 2  ;;  %v397_v17 = vrot.slane %v3045_v38, 2  ;;  %v3078_v46 = vld [vmem:[#allocation30_spill] sm:$0xff] }
  0x3b   :  { %v1756_v61 = vsel %vm370_vm1, %v387_v58, %v389_v15  ;;  %v399_v49 = vrot.slane %v3076_v27, 2  ;;  %v401_v28 = vrot.slane %v1294_v31, 2  ;;  %v402_v29 = vrot.slane %v1296_v32, 2  ;;  %v3079_v15 = vld [vmem:[#allocation33_spill] sm:$0xff] }
  0x3c   :  { %v404_v55 = vrot.slane %v3077_v14, 2  ;;  %v406_v48 = vrot.slane %v3046_v2, 2  ;;  %v407_v43 = vrot.slane %v3047_v3, 2  ;;  %v409_v25 = vrot.slane %v3078_v46, 2  ;;  %v3080_v14 = vld [vmem:[#allocation38_spill] sm:$0xff]  ;;  %v3081_v3 = vld [vmem:[#allocation41_spill] sm:$0xff] }
  0x3d   :  { %v411_v37 = vrot.slane %v3048_v9, 2  ;;  %v412_v58 = vrot.slane %v3049_v7, 2  ;;  %v414_v38 = vrot.slane %v3079_v15, 2  ;;  %v1770_v27 = vsel %vm370_vm1, %v391_v20, %v392_v22 }
  0x3e   :  { %v416_v31 = vrot.slane %v1357_v57, 2  ;;  %v417_v32 = vrot.slane %v3050_v56, 2  ;;  %v419_v24 = vrot.slane %v3080_v14, 2  ;;  %v1776_v2 = vsel %vm370_vm1, %v392_v22, %v394_v10  ;;  %v3091_v56 = vld [vmem:[#allocation61_spill] sm:$0xff] }
  0x3f   :  { %v421_v46 = vrot.slane %v3051_v47, 2  ;;  %v422_v9 = vrot.slane %v1344_v52, 2  ;;  %v424_v7 = vrot.slane %v3081_v3, 2  ;;  %v1782_v15 = vsel %vm370_vm1, %v396_v44, %v397_v17  ;;  %v3089_v47 = vld [vmem:[#allocation57_spill] sm:$0xff] }
  0x40   :  { %v1785_v20 = vsel %vm370_vm1, %v397_v17, %v399_v49  ;;  %v1788_v57 = vsel %vm370_vm1, %v401_v28, %v402_v29  ;;  %v1791_v14 = vsel %vm370_vm1, %v402_v29, %v404_v55  ;;  %v1794_v10 = vsel %vm370_vm1, %v406_v48, %v407_v43  ;;  %v3085_v55 = vld [vmem:[#allocation45_spill] sm:$0xff] }
  0x41   :  { %v1797_v22 = vsel %vm370_vm1, %v407_v43, %v409_v25  ;;  %v1800_v3 = vsel %vm370_vm1, %v411_v37, %v412_v58  ;;  %v1803_v44 = vsel %vm370_vm1, %v412_v58, %v414_v38  ;;  %v1806_v49 = vsel %vm370_vm1, %v416_v31, %v417_v32  ;;  %v3084_v37 = vld [vmem:[#allocation44_spill] sm:$0xff] }
  0x42   :  { %v1809_v17 = vsel %vm370_vm1, %v417_v32, %v419_v24  ;;  %v426_v28 = vrot.slane %v3052_v60, 2  ;;  %v427_v48 = vrot.slane %v3053_v40, 2  ;;  %v1814_v29 = vsel %vm370_vm1, %v421_v46, %v422_v9  ;;  %v3086_v60 = vld [vmem:[#allocation50_spill] sm:$0xff] }
  0x43   :  { %3082 = vst [vmem:[#allocation101_spill] sm:$0xff] %v1814_v29  ;;  %v1817_v25 = vsel %vm370_vm1, %v422_v9, %v424_v7  ;;  %v429_v43 = vrot.slane %v3084_v37, 2  ;;  %v431_v38 = vrot.slane %v3055_v42, 2  ;;  %v432_v31 = vrot.slane %v3056_v0, 2  ;;  %v3087_v9 = vld [vmem:[#allocation53_spill] sm:$0xff]  ;;  %v3090_v29 = vld [vmem:[#allocation60_spill] sm:$0xff] }
  0x44   :  { %3083 = vst [vmem:[#allocation102_spill] sm:$0xff] %v1817_v25  ;;  %v434_v58 = vrot.slane %v3085_v55, 2  ;;  %v436_v24 = vrot.slane %v3057_v51, 2  ;;  %v437_v32 = vrot.slane %v3058_v8, 2  ;;  %v439_v40 = vrot.slane %v3086_v60, 2  ;;  %v3088_v25 = vld [vmem:[#allocation56_spill] sm:$0xff] }
  0x45   :  { %v441_v46 = vrot.slane %v3059_v16, 2  ;;  %v442_v52 = vrot.slane %v3060_v6, 2  ;;  %v444_v7 = vrot.slane %v3087_v9, 2  ;;  %v446_v37 = vrot.slane %v3062_v13, 2 }
  0x46   :  { %v447_v42 = vrot.slane %v3063_v23, 2  ;;  %v449_v0 = vrot.slane %v3088_v25, 2  ;;  %v451_v55 = vrot.slane %v3068_v4, 2  ;;  %v452_v51 = vrot.slane %v3069_v33, 2 }
  0x47   :  { %v454_v8 = vrot.slane %v3089_v47, 2  ;;  %v456_v60 = vrot.slane %v3070_v19, 2  ;;  %v457_v16 = vrot.slane %v3071_v45, 2  ;;  %v459_v6 = vrot.slane %v3090_v29, 2 }
  0x48   :  { %v461_v9 = vrot.slane %v3021_v59, 2  ;;  %v462_v13 = vrot.slane %v3074_v62, 2  ;;  %v464_v23 = vrot.slane %v3091_v56, 2  ;;  %v428_v25 = vsel %vm370_vm1, %v426_v28, %v427_v48 }
  0x49   :  { %v430_v4 = vsel %vm370_vm1, %v427_v48, %v429_v43  ;;  %v433_v33 = vsel %vm370_vm1, %v431_v38, %v432_v31  ;;  %v435_v47 = vsel %vm370_vm1, %v432_v31, %v434_v58  ;;  %v438_v19 = vsel %vm370_vm1, %v436_v24, %v437_v32  ;;  %v3092_v58 = vld [vmem:[#allocation65_spill] sm:$0xff] }
  0x4a   :  { %v440_v45 = vsel %vm370_vm1, %v437_v32, %v439_v40  ;;  %v443_v29 = vsel %vm370_vm1, %v441_v46, %v442_v52  ;;  %v445_v59 = vsel %vm370_vm1, %v442_v52, %v444_v7  ;;  %v448_v62 = vsel %vm370_vm1, %v446_v37, %v447_v42 }
  0x4b   :  { %v450_v56 = vsel %vm370_vm1, %v447_v42, %v449_v0  ;;  %v453_v28 = vsel %vm370_vm1, %v451_v55, %v452_v51  ;;  %v455_v48 = vsel %vm370_vm1, %v452_v51, %v454_v8  ;;  %v458_v43 = vsel %vm370_vm1, %v456_v60, %v457_v16  ;;  %v3094_v42 = vld [vmem:[#allocation66_spill] sm:$0xff] }
  0x4c   :  { %v460_v38 = vsel %vm370_vm1, %v457_v16, %v459_v6  ;;  %v463_v31 = vsel %vm370_vm1, %v461_v9, %v462_v13  ;;  %v465_v40 = vsel %vm370_vm1, %v462_v13, %v464_v23  ;;  %v3093_v52 = vmax.f32 %v3038_v18, %v3092_v58  ;;  %v3099_v16 = vld [vmem:[#allocation67_spill] sm:$0xff] }
  0x4d   :  { %v3095_v0 = vmax.f32 %v3039_v35, %v3094_v42  ;;  %v3096_v51 = vmax.f32 %v3040_v63, %v1479_v34  ;;  %v3097_v23 = vmax.f32 %v3041_v1, %v1482_v30  ;;  %v3105_v30 = vld [vmem:[#allocation17_spill] sm:$0xff] }
  0x4e   :  { %v1861_v24 = vmax.f32 %v3093_v52, %v1731_v5  ;;  %v3098_v5 = vmax.f32 %v1246_v11, %v1485_v36  ;;  %v3109_v36 = vld [vmem:[#allocation15_spill] sm:$0xff] }
  0x4f   :  { %v1867_v37 = vmax.f32 %v3095_v0, %v1734_v21  ;;  %v1873_v60 = vmax.f32 %v3096_v51, %v1737_v12  ;;  %v1879_v13 = vmax.f32 %v3097_v23, %v1740_v41  ;;  %v3100_v21 = vmax.f32 %v3042_v53, %v3099_v16  ;;  %v3102_v12 = vld [vmem:[#allocation68_spill] sm:$0xff]  ;;  %v3106_v41 = vld [vmem:[#allocation69_spill] sm:$0xff]  ;;  %v3114_v52 = vld [vmem:[#allocation63_spill] sm:$0xff] }
  0x50   :  { %v1885_v8 = vmax.f32 %v3098_v5, %v1743_v39  ;;  %v3103_v34 = vmax.f32 %v3043_v50, %v3102_v12  ;;  %v3107_v32 = vmax.f32 %v3105_v30, %v3106_v41  ;;  %v3110_v39 = vld [vmem:[#allocation70_spill] sm:$0xff]  ;;  %v648_v42 = vrot.slane %v3114_v52, 3  ;;  %v3115_v0 = vld [vmem:[#allocation64_spill] sm:$0xff]  ;;  %v3117_v23 = vld [vmem:[#allocation71_spill] sm:$0xff] }
  0x51   :  { %v1891_v6 = vmax.f32 %v3100_v21, %v1746_v26  ;;  %v3111_v9 = vmax.f32 %v3109_v36, %v3110_v39  ;;  %v3113_v26 = vld [vmem:[#allocation62_spill] sm:$0xff]  ;;  %v650_v51 = vrot.slane %v3115_v0, 3  ;;  %v3121_v21 = vld [vmem:[#allocation72_spill] sm:$0xff]  ;;  %v3125_v41 = vld [vmem:[#allocation73_spill] sm:$0xff] }
  0x52   :  { %v1897_v55 = vmax.f32 %v3103_v34, %v1750_v54  ;;  %v1903_v46 = vmax.f32 %v3107_v32, %v1756_v61  ;;  %v647_v58 = vrot.slane %v3113_v26, 3  ;;  %v3116_v54 = vld [vmem:[#allocation16_spill] sm:$0xff]  ;;  %v3120_v61 = vld [vmem:[#allocation22_spill] sm:$0xff] }
  0x53   :  { %3101 = vst [vmem:[#allocation65_spill] sm:$0xff] %v1891_v6  ;;  %v1909_v7 = vmax.f32 %v3111_v9, %v1770_v27  ;;  %v3118_v5 = vmax.f32 %v3116_v54, %v3117_v23  ;;  %v3122_v12 = vmax.f32 %v3120_v61, %v3121_v21  ;;  %v3124_v27 = vld [vmem:[#allocation25_spill] sm:$0xff]  ;;  %v3128_v9 = vld [vmem:[#allocation19_spill] sm:$0xff]  ;;  %v3137_v21 = vld [vmem:[#allocation76_spill] sm:$0xff] }
  0x54   :  { %3104 = vst [vmem:[#allocation66_spill] sm:$0xff] %v1897_v55  ;;  %3108 = vst [vmem:[#allocation67_spill] sm:$0xff] %v1903_v46  ;;  %v3126_v32 = vmax.f32 %v3124_v27, %v3125_v41  ;;  %v3133_v23 = vld [vmem:[#allocation75_spill] sm:$0xff]  ;;  %v3141_v41 = vld [vmem:[#allocation77_spill] sm:$0xff] }
  0x55   :  { %3112 = vst [vmem:[#allocation68_spill] sm:$0xff] %v1909_v7  ;;  %v1918_v16 = vmax.f32 %v3118_v5, %v1776_v2  ;;  %v1924_v34 = vmax.f32 %v3122_v12, %v1782_v15  ;;  %v3129_v7 = vld [vmem:[#allocation74_spill] sm:$0xff]  ;;  %v3132_v2 = vld [vmem:[#allocation20_spill] sm:$0xff]  ;;  %v3230_v6 = vld [vmem:[#allocation97_spill] sm:$0xff] }
  0x56   :  { %v1930_v39 = vmax.f32 %v3126_v32, %v1785_v20  ;;  %v3130_v0 = vmax.f32 %v3128_v9, %v3129_v7  ;;  %v3134_v5 = vmax.f32 %v3132_v2, %v3133_v23  ;;  %v3136_v15 = vld [vmem:[#allocation28_spill] sm:$0xff]  ;;  %v3140_v20 = vld [vmem:[#allocation29_spill] sm:$0xff]  ;;  %v3145_v7 = vld [vmem:[#allocation78_spill] sm:$0xff] }
  0x57   :  { %3119 = vst [vmem:[#allocation69_spill] sm:$0xff] %v1918_v16  ;;  %3123 = vst [vmem:[#allocation70_spill] sm:$0xff] %v1924_v34  ;;  %v3138_v12 = vmax.f32 %v3136_v15, %v3137_v21  ;;  %v3142_v32 = vmax.f32 %v3140_v20, %v3141_v41  ;;  %v3149_v23 = vld [vmem:[#allocation79_spill] sm:$0xff]  ;;  %v3153_v21 = vld [vmem:[#allocation80_spill] sm:$0xff] }
  0x58   :  { %3127 = vst [vmem:[#allocation71_spill] sm:$0xff] %v1930_v39  ;;  %v1936_v52 = vmax.f32 %v3130_v0, %v1788_v57  ;;  %v1942_v16 = vmax.f32 %v3134_v5, %v1791_v14  ;;  %v3144_v57 = vld [vmem:[#allocation23_spill] sm:$0xff]  ;;  %v3148_v14 = vld [vmem:[#allocation24_spill] sm:$0xff]  ;;  %v3157_v41 = vld [vmem:[#allocation81_spill] sm:$0xff] }
  0x59   :  { %v1948_v34 = vmax.f32 %v3138_v12, %v1794_v10  ;;  %v1954_v39 = vmax.f32 %v3142_v32, %v1797_v22  ;;  %v3146_v0 = vmax.f32 %v3144_v57, %v3145_v7  ;;  %v3150_v5 = vmax.f32 %v3148_v14, %v3149_v23  ;;  %v3152_v10 = vld [vmem:[#allocation34_spill] sm:$0xff]  ;;  %v3156_v22 = vld [vmem:[#allocation37_spill] sm:$0xff]  ;;  %v3161_v7 = vld [vmem:[#allocation31_spill] sm:$0xff] }
  0x5a   :  { %3131 = vst [vmem:[#allocation72_spill] sm:$0xff] %v1936_v52  ;;  %3135 = vst [vmem:[#allocation73_spill] sm:$0xff] %v1942_v16  ;;  %v3154_v12 = vmax.f32 %v3152_v10, %v3153_v21  ;;  %v3158_v32 = vmax.f32 %v3156_v22, %v3157_v41  ;;  %v3173_v41 = vld [vmem:[#allocation84_spill] sm:$0xff] }
  0x5b   :  { %3139 = vst [vmem:[#allocation74_spill] sm:$0xff] %v1948_v34  ;;  %3143 = vst [vmem:[#allocation75_spill] sm:$0xff] %v1954_v39  ;;  %v1960_v52 = vmax.f32 %v3146_v0, %v1800_v3  ;;  %v1966_v16 = vmax.f32 %v3150_v5, %v1803_v44  ;;  %v3160_v3 = vld [vmem:[#allocation101_spill] sm:$0xff]  ;;  %v3162_v0 = vld [vmem:[#allocation82_spill] sm:$0xff] }
  0x5c   :  { %v1972_v34 = vmax.f32 %v3154_v12, %v1806_v49  ;;  %v1978_v39 = vmax.f32 %v3158_v32, %v1809_v17  ;;  %v3165_v44 = vld [vmem:[#allocation102_spill] sm:$0xff]  ;;  %v3166_v5 = vld [vmem:[#allocation32_spill] sm:$0xff]  ;;  %v1993_v49 = vsel %vm551_vm2, %v647_v58, %v648_v42  ;;  %v1996_v12 = vsel %vm551_vm2, %v648_v42, %v650_v51 }
  0x5d   :  { %3147 = vst [vmem:[#allocation76_spill] sm:$0xff] %v1960_v52  ;;  %3151 = vst [vmem:[#allocation77_spill] sm:$0xff] %v1966_v16  ;;  %v3163_v52 = vmax.f32 %v3161_v7, %v3162_v0  ;;  %v3167_v16 = vld [vmem:[#allocation83_spill] sm:$0xff]  ;;  %v3172_v17 = vld [vmem:[#allocation42_spill] sm:$0xff] }
  0x5e   :  { %3155 = vst [vmem:[#allocation78_spill] sm:$0xff] %v1972_v34  ;;  %3159 = vst [vmem:[#allocation79_spill] sm:$0xff] %v1978_v39  ;;  %v3168_v26 = vmax.f32 %v3166_v5, %v3167_v16  ;;  %v3174_v32 = vmax.f32 %v3172_v17, %v3173_v41  ;;  %v3176_v0 = vld [vmem:[#allocation43_spill] sm:$0xff]  ;;  %v3181_v16 = vld [vmem:[#allocation86_spill] sm:$0xff] }
  0x5f   :  { %v1984_v23 = vmax.f32 %v3163_v52, %v3160_v3  ;;  %3170 = vst [vmem:[#allocation101_spill] sm:$0xff] %v1993_v49  ;;  %3171 = vst [vmem:[#allocation82_spill] sm:$0xff] %v1996_v12  ;;  %v3177_v52 = vld [vmem:[#allocation85_spill] sm:$0xff]  ;;  %v3180_v34 = vld [vmem:[#allocation35_spill] sm:$0xff] }
  0x60   :  { %v1990_v21 = vmax.f32 %v3168_v26, %v3165_v44  ;;  %v2001_v39 = vmax.f32 %v3174_v32, %v428_v25  ;;  %v3178_v3 = vmax.f32 %v3176_v0, %v3177_v52  ;;  %v3182_v26 = vmax.f32 %v3180_v34, %v3181_v16  ;;  %v3184_v58 = vld [vmem:[#allocation36_spill] sm:$0xff]  ;;  %v3188_v51 = vld [vmem:[#allocation46_spill] sm:$0xff]  ;;  %v3192_v32 = vld [vmem:[#allocation49_spill] sm:$0xff] }
  0x61   :  { %3164 = vst [vmem:[#allocation80_spill] sm:$0xff] %v1984_v23  ;;  %v3189_v55 = vld [vmem:[#allocation88_spill] sm:$0xff]  ;;  %v3214_v49 = vld [vmem:[#allocation93_spill] sm:$0xff]  ;;  %v3218_v12 = vld [vmem:[#allocation94_spill] sm:$0xff] }
  0x62   :  { %3169 = vst [vmem:[#allocation81_spill] sm:$0xff] %v1990_v21  ;;  %3175 = vst [vmem:[#allocation102_spill] sm:$0xff] %v2001_v39  ;;  %v2006_v23 = vmax.f32 %v3178_v3, %v430_v4  ;;  %v2011_v44 = vmax.f32 %v3182_v26, %v433_v33  ;;  %v3185_v21 = vld [vmem:[#allocation87_spill] sm:$0xff]  ;;  %v3190_v41 = vmax.f32 %v3188_v51, %v3189_v55  ;;  %v3193_v39 = vld [vmem:[#allocation89_spill] sm:$0xff] }
  0x63   :  { %v3186_v46 = vmax.f32 %v3184_v58, %v3185_v21  ;;  %v3194_v52 = vmax.f32 %v3192_v32, %v3193_v39  ;;  %v3196_v3 = vld [vmem:[#allocation39_spill] sm:$0xff]  ;;  %v3200_v26 = vld [vmem:[#allocation40_spill] sm:$0xff] }
  0x64   :  { %3179 = vst [vmem:[#allocation83_spill] sm:$0xff] %v2006_v23  ;;  %3183 = vst [vmem:[#allocation84_spill] sm:$0xff] %v2011_v44  ;;  %v2021_v25 = vmax.f32 %v3190_v41, %v438_v19  ;;  %v3197_v23 = vld [vmem:[#allocation90_spill] sm:$0xff]  ;;  %v3201_v44 = vld [vmem:[#allocation91_spill] sm:$0xff]  ;;  %v552_v41 = vrot.slane %v3038_v18, 3 }
  0x65   :  { %v2016_v42 = vmax.f32 %v3186_v46, %v435_v47  ;;  %v2026_v4 = vmax.f32 %v3194_v52, %v440_v45  ;;  %v3198_v16 = vmax.f32 %v3196_v3, %v3197_v23  ;;  %v3202_v21 = vmax.f32 %v3200_v26, %v3201_v44  ;;  %v3204_v46 = vld [vmem:[#allocation54_spill] sm:$0xff]  ;;  %v3212_v18 = vld [vmem:[#allocation13_spill] sm:$0xff]  ;;  %v3213_v39 = vld [vmem:[#allocation55_spill] sm:$0xff] }
  0x66   :  { %3191 = vst [vmem:[#allocation86_spill] sm:$0xff] %v2021_v25  ;;  %v558_v44 = vrot.slane %v3041_v1, 3  ;;  %v3215_v45 = vmax.f32 %v3213_v39, %v3214_v49  ;;  %v3222_v1 = vld [vmem:[#allocation95_spill] sm:$0xff] }
  0x67   :  { %3187 = vst [vmem:[#allocation85_spill] sm:$0xff] %v2016_v42  ;;  %3195 = vst [vmem:[#allocation87_spill] sm:$0xff] %v2026_v4  ;;  %v2031_v33 = vmax.f32 %v3198_v16, %v443_v29  ;;  %v2036_v47 = vmax.f32 %v3202_v21, %v445_v59  ;;  %v3205_v42 = vld [vmem:[#allocation92_spill] sm:$0xff]  ;;  %v553_v29 = vrot.slane %v3039_v35, 3  ;;  %v3210_v16 = vld [vmem:[#allocation9_spill] sm:$0xff]  ;;  %v557_v59 = vrot.slane %v3040_v63, 3 }
  0x68   :  { %v3206_v55 = vmax.f32 %v3204_v46, %v3205_v42  ;;  %v3211_v21 = vld [vmem:[#allocation12_spill] sm:$0xff]  ;;  %v2059_v23 = vmax.f32 %v3215_v45, %v450_v56  ;;  %v3217_v35 = vld [vmem:[#allocation47_spill] sm:$0xff]  ;;  %v567_v45 = vrot.slane %v3043_v50, 3 }
  0x69   :  { %3199 = vst [vmem:[#allocation88_spill] sm:$0xff] %v2031_v33  ;;  %3203 = vst [vmem:[#allocation89_spill] sm:$0xff] %v2036_v47  ;;  %v555_v33 = vrot.slane %v3210_v16, 3  ;;  %v560_v42 = vrot.slane %v3211_v21, 3  ;;  %v3219_v16 = vmax.f32 %v3217_v35, %v3218_v12  ;;  %v3221_v63 = vld [vmem:[#allocation48_spill] sm:$0xff]  ;;  %v3233_v12 = vld [vmem:[#allocation18_spill] sm:$0xff] }
  0x6a   :  { %v2041_v19 = vmax.f32 %v3206_v55, %v448_v62  ;;  %v562_v62 = vrot.slane %v1246_v11, 3  ;;  %v563_v55 = vrot.slane %v3042_v53, 3  ;;  %3216 = vst [vmem:[#allocation91_spill] sm:$0xff] %v2059_v23  ;;  %v3223_v47 = vmax.f32 %v3221_v63, %v3222_v1  ;;  %v3225_v11 = vld [vmem:[#allocation58_spill] sm:$0xff]  ;;  %v3226_v4 = vld [vmem:[#allocation96_spill] sm:$0xff] }
  0x6b   :  { %v2064_v52 = vmax.f32 %v3219_v16, %v453_v28  ;;  %v3227_v53 = vmax.f32 %v3225_v11, %v3226_v4  ;;  %v568_v28 = vrot.slane %v3105_v30, 3  ;;  %v570_v16 = vrot.slane %v3233_v12, 3  ;;  %v3235_v1 = vld [vmem:[#allocation98_spill] sm:$0xff]  ;;  %v3239_v4 = vld [vmem:[#allocation99_spill] sm:$0xff]  ;;  %v3269_v30 = vld [vmem:[#allocation60_spill] sm:$0xff] }
  0x6c   :  { %3207 = vst [vmem:[#allocation90_spill] sm:$0xff] %v2041_v19  ;;  %v565_v19 = vrot.slane %v3212_v18, 3  ;;  %v2069_v21 = vmax.f32 %v3223_v47, %v455_v48  ;;  %v3229_v18 = vld [vmem:[#allocation59_spill] sm:$0xff]  ;;  %v2104_v12 = vsel %vm551_vm2, %v558_v44, %v560_v42  ;;  %v3245_v42 = vld [vmem:[#allocation26_spill] sm:$0xff] }
  0x6d   :  { %3220 = vst [vmem:[#allocation92_spill] sm:$0xff] %v2064_v52  ;;  %v2074_v25 = vmax.f32 %v3227_v53, %v458_v43  ;;  %v3231_v49 = vmax.f32 %v3229_v18, %v3230_v6  ;;  %v3234_v52 = vld [vmem:[#allocation51_spill] sm:$0xff]  ;;  %v2095_v6 = vsel %vm551_vm2, %v552_v41, %v553_v29  ;;  %v573_v41 = vrot.slane %v3116_v54, 3 }
  0x6e   :  { %3224 = vst [vmem:[#allocation93_spill] sm:$0xff] %v2069_v21  ;;  %v3236_v48 = vmax.f32 %v3234_v52, %v3235_v1  ;;  %v3238_v21 = vld [vmem:[#allocation52_spill] sm:$0xff]  ;;  %v2110_v1 = vsel %vm551_vm2, %v563_v55, %v565_v19  ;;  %v582_v19 = vrot.slane %v3128_v9, 3  ;;  %v592_v54 = vrot.slane %v3144_v57, 3 }
  0x6f   :  { %3228 = vst [vmem:[#allocation94_spill] sm:$0xff] %v2074_v25  ;;  %v2079_v56 = vmax.f32 %v3231_v49, %v460_v38  ;;  %v3240_v53 = vmax.f32 %v3238_v21, %v3239_v4  ;;  %v2098_v38 = vsel %vm551_vm2, %v553_v29, %v555_v33  ;;  %v2101_v49 = vsel %vm551_vm2, %v557_v59, %v558_v44  ;;  %v3350_v25 = vld [vmem:[#allocation30_spill] sm:$0xff] }
  0x70   :  { %v2087_v47 = vmax.f32 %v3236_v48, %v463_v31  ;;  %v2107_v31 = vsel %vm551_vm2, %v562_v62, %v563_v55  ;;  %v3242_v48 = vld [vmem:[#allocation21_spill] sm:$0xff]  ;;  %v577_v33 = vrot.slane %v3120_v61, 3  ;;  %v2117_v29 = vsel %vm551_vm2, %v567_v45, %v568_v28 }
  0x71   :  { %3232 = vst [vmem:[#allocation95_spill] sm:$0xff] %v2079_v56  ;;  %v2092_v43 = vmax.f32 %v3240_v53, %v465_v40  ;;  %v572_v40 = vrot.slane %v3109_v36, 3  ;;  %v575_v4 = vrot.slane %v3242_v48, 3  ;;  %3243 = vst [vmem:[#allocation98_spill] sm:$0xff] %v2117_v29  ;;  %v2120_v59 = vsel %vm551_vm2, %v568_v28, %v570_v16  ;;  %v3246_v53 = vld [vmem:[#allocation27_spill] sm:$0xff]  ;;  %v3247_v48 = vld [vmem:[#allocation30_spill] sm:$0xff] }
  0x72   :  { %3237 = vst [vmem:[#allocation96_spill] sm:$0xff] %v2087_v47  ;;  %3244 = vst [vmem:[#allocation99_spill] sm:$0xff] %v2120_v59  ;;  %v578_v44 = vrot.slane %v3124_v27, 3  ;;  %v580_v62 = vrot.slane %v3245_v42, 3  ;;  %v583_v55 = vrot.slane %v3132_v2, 3  ;;  %v587_v47 = vrot.slane %v3136_v15, 3 }
  0x73   :  { %3241 = vst [vmem:[#allocation97_spill] sm:$0xff] %v2092_v43  ;;  %v585_v43 = vrot.slane %v3246_v53, 3  ;;  %v588_v61 = vrot.slane %v3140_v20, 3  ;;  %v590_v45 = vrot.slane %v3247_v48, 3  ;;  %v593_v28 = vrot.slane %v3148_v14, 3  ;;  %v3248_v16 = vld [vmem:[#allocation33_spill] sm:$0xff] }
  0x74   :  { %v595_v27 = vrot.slane %v3248_v16, 3  ;;  %v597_v42 = vrot.slane %v3152_v10, 3  ;;  %v598_v9 = vrot.slane %v3156_v22, 3  ;;  %v3249_v36 = vld [vmem:[#allocation38_spill] sm:$0xff]  ;;  %v2137_v53 = vsel %vm551_vm2, %v572_v40, %v573_v41  ;;  %v3268_v20 = vld [vmem:[#allocation57_spill] sm:$0xff]  ;;  %v3304_v59 = vld [vmem:[#allocation79_spill] sm:$0xff] }
  0x75   :  { %v600_v2 = vrot.slane %v3249_v36, 3  ;;  %3250 = vst [vmem:[#allocation103_spill] sm:$0xff] %v2137_v53  ;;  %v2140_v15 = vsel %vm551_vm2, %v573_v41, %v575_v4  ;;  %v602_v48 = vrot.slane %v3161_v7, 3  ;;  %v603_v57 = vrot.slane %v3166_v5, 3  ;;  %v3255_v36 = vld [vmem:[#allocation41_spill] sm:$0xff] }
  0x76   :  { %3251 = vst [vmem:[#allocation104_spill] sm:$0xff] %v2140_v15  ;;  %v2145_v14 = vsel %vm551_vm2, %v577_v33, %v578_v44  ;;  %v2148_v16 = vsel %vm551_vm2, %v578_v44, %v580_v62  ;;  %v2151_v22 = vsel %vm551_vm2, %v582_v19, %v583_v55  ;;  %v605_v10 = vrot.slane %v3255_v36, 3  ;;  %v3317_v29 = vld [vmem:[#allocation101_spill] sm:$0xff] }
  0x77   :  { %3252 = vst [vmem:[#allocation105_spill] sm:$0xff] %v2145_v14  ;;  %3253 = vst [vmem:[#allocation106_spill] sm:$0xff] %v2148_v16  ;;  %v2155_v40 = vsel %vm551_vm2, %v583_v55, %v585_v43  ;;  %v2158_v41 = vsel %vm551_vm2, %v587_v47, %v588_v61  ;;  %v2161_v4 = vsel %vm551_vm2, %v588_v61, %v590_v45  ;;  %v607_v43 = vrot.slane %v3172_v17, 3  ;;  %v3262_v55 = vld [vmem:[#allocation44_spill] sm:$0xff]  ;;  %v3265_v17 = vld [vmem:[#allocation50_spill] sm:$0xff] }
  0x78   :  { %3254 = vst [vmem:[#allocation107_spill] sm:$0xff] %v2151_v22  ;;  %3256 = vst [vmem:[#allocation108_spill] sm:$0xff] %v2155_v40  ;;  %v2164_v33 = vsel %vm551_vm2, %v592_v54, %v593_v28  ;;  %v2167_v44 = vsel %vm551_vm2, %v593_v28, %v595_v27  ;;  %v2170_v62 = vsel %vm551_vm2, %v597_v42, %v598_v9  ;;  %v608_v61 = vrot.slane %v3176_v0, 3  ;;  %v3264_v28 = vld [vmem:[#allocation45_spill] sm:$0xff]  ;;  %v3327_v16 = vld [vmem:[#allocation6_spill] sm:$0xff] }
  0x79   :  { %3257 = vst [vmem:[#allocation109_spill] sm:$0xff] %v2161_v4  ;;  %3258 = vst [vmem:[#allocation110_spill] sm:$0xff] %v2164_v33  ;;  %v2173_v19 = vsel %vm551_vm2, %v598_v9, %v600_v2  ;;  %v2177_v47 = vsel %vm551_vm2, %v602_v48, %v603_v57  ;;  %v610_v45 = vrot.slane %v3262_v55, 3  ;;  %v612_v54 = vrot.slane %v3180_v34, 3  ;;  %v3266_v55 = vld [vmem:[#allocation53_spill] sm:$0xff]  ;;  %v3307_v33 = vld [vmem:[#allocation102_spill] sm:$0xff] }
  0x7a   :  { %3259 = vst [vmem:[#allocation111_spill] sm:$0xff] %v2167_v44  ;;  %3260 = vst [vmem:[#allocation112_spill] sm:$0xff] %v2170_v62  ;;  %v2183_v27 = vsel %vm551_vm2, %v603_v57, %v605_v10  ;;  %v613_v42 = vrot.slane %v3184_v58, 3  ;;  %v615_v36 = vrot.slane %v3264_v28, 3  ;;  %v617_v9 = vrot.slane %v3188_v51, 3  ;;  %v3267_v10 = vld [vmem:[#allocation56_spill] sm:$0xff] }
  0x7b   :  { %3261 = vst [vmem:[#allocation113_spill] sm:$0xff] %v2173_v19  ;;  %3263 = vst [vmem:[#allocation114_spill] sm:$0xff] %v2183_v27  ;;  %v618_v2 = vrot.slane %v3192_v32, 3  ;;  %v620_v48 = vrot.slane %v3265_v17, 3  ;;  %v622_v5 = vrot.slane %v3196_v3, 3  ;;  %v623_v0 = vrot.slane %v3200_v26, 3 }
  0x7c   :  { %v625_v7 = vrot.slane %v3266_v55, 3  ;;  %v627_v34 = vrot.slane %v3204_v46, 3  ;;  %v628_v57 = vrot.slane %v3213_v39, 3  ;;  %v630_v58 = vrot.slane %v3267_v10, 3  ;;  %v3306_v4 = vld [vmem:[#allocation81_spill] sm:$0xff]  ;;  %v3316_v44 = vld [vmem:[#allocation14_spill] sm:$0xff] }
  0x7d   :  { %v632_v28 = vrot.slane %v3217_v35, 3  ;;  %v633_v51 = vrot.slane %v3221_v63, 3  ;;  %v635_v32 = vrot.slane %v3268_v20, 3  ;;  %v637_v17 = vrot.slane %v3225_v11, 3  ;;  %v3273_v20 = vld [vmem:[#allocation61_spill] sm:$0xff]  ;;  %v3320_v19 = vld [vmem:[#allocation100_spill] sm:$0xff] }
  0x7e   :  { %v638_v3 = vrot.slane %v3229_v18, 3  ;;  %v640_v26 = vrot.slane %v3269_v30, 3  ;;  %v642_v55 = vrot.slane %v3234_v52, 3  ;;  %v643_v46 = vrot.slane %v3238_v21, 3  ;;  %v3301_v21 = vld [vmem:[#allocation76_spill] sm:$0xff]  ;;  %v3302_v18 = vld [vmem:[#allocation77_spill] sm:$0xff] }
  0x7f   :  { %v2205_v39 = vsel %vm551_vm2, %v607_v43, %v608_v61  ;;  %v2208_v10 = vsel %vm551_vm2, %v608_v61, %v610_v45  ;;  %v2211_v63 = vsel %vm551_vm2, %v612_v54, %v613_v42  ;;  %v645_v35 = vrot.slane %v3273_v20, 3  ;;  %v3300_v20 = vld [vmem:[#allocation75_spill] sm:$0xff]  ;;  %v3338_v27 = vld [vmem:[#allocation16_spill] sm:$0xff]  ;;  %v3339_v14 = vld [vmem:[#allocation21_spill] sm:$0xff] }
  0x80   :  { %3270 = vst [vmem:[#allocation115_spill] sm:$0xff] %v2205_v39  ;;  %3271 = vst [vmem:[#allocation116_spill] sm:$0xff] %v2208_v10  ;;  %v2215_v11 = vsel %vm551_vm2, %v613_v42, %v615_v36  ;;  %v2218_v30 = vsel %vm551_vm2, %v617_v9, %v618_v2  ;;  %v2221_v52 = vsel %vm551_vm2, %v618_v2, %v620_v48  ;;  %v3290_v2 = vld [vmem:[#allocation62_spill] sm:$0xff]  ;;  %v3326_v10 = vld [vmem:[#allocation5_spill] sm:$0xff] }
  0x81   :  { %3272 = vst [vmem:[#allocation117_spill] sm:$0xff] %v2211_v63  ;;  %3274 = vst [vmem:[#allocation118_spill] sm:$0xff] %v2215_v11  ;;  %v2224_v43 = vsel %vm551_vm2, %v622_v5, %v623_v0  ;;  %v2227_v61 = vsel %vm551_vm2, %v623_v0, %v625_v7  ;;  %v2230_v45 = vsel %vm551_vm2, %v627_v34, %v628_v57  ;;  %v828_v48 = vrot.slane %v3290_v2, 4  ;;  %v3298_v2 = vld [vmem:[#allocation73_spill] sm:$0xff]  ;;  %v3321_v11 = vld [vmem:[#allocation82_spill] sm:$0xff] }
  0x82   :  { %3275 = vst [vmem:[#allocation119_spill] sm:$0xff] %v2218_v30  ;;  %3276 = vst [vmem:[#allocation120_spill] sm:$0xff] %v2221_v52  ;;  %v2233_v54 = vsel %vm551_vm2, %v628_v57, %v630_v58  ;;  %v2236_v36 = vsel %vm551_vm2, %v632_v28, %v633_v51  ;;  %v2239_v42 = vsel %vm551_vm2, %v633_v51, %v635_v32  ;;  %v3291_v57 = vld [vmem:[#allocation63_spill] sm:$0xff]  ;;  %v3292_v51 = vld [vmem:[#allocation64_spill] sm:$0xff] }
  0x83   :  { %3277 = vst [vmem:[#allocation121_spill] sm:$0xff] %v2224_v43  ;;  %3278 = vst [vmem:[#allocation122_spill] sm:$0xff] %v2227_v61  ;;  %v2242_v9 = vsel %vm551_vm2, %v637_v17, %v638_v3  ;;  %v2245_v5 = vsel %vm551_vm2, %v638_v3, %v640_v26  ;;  %v2248_v7 = vsel %vm551_vm2, %v642_v55, %v643_v46  ;;  %v3287_v3 = vld [vmem:[#allocation65_spill] sm:$0xff]  ;;  %v829_v58 = vrot.slane %v3291_v57, 4  ;;  %v3293_v17 = vld [vmem:[#allocation68_spill] sm:$0xff] }
  0x84   :  { %3279 = vst [vmem:[#allocation123_spill] sm:$0xff] %v2230_v45  ;;  %3280 = vst [vmem:[#allocation124_spill] sm:$0xff] %v2233_v54  ;;  %v2251_v34 = vsel %vm551_vm2, %v643_v46, %v645_v35  ;;  %v3288_v35 = vld [vmem:[#allocation66_spill] sm:$0xff]  ;;  %v831_v0 = vrot.slane %v3292_v51, 4  ;;  %v3294_v32 = vld [vmem:[#allocation69_spill] sm:$0xff]  ;;  %v3318_v63 = vmax.f32 %v3316_v44, %v3317_v29  ;;  %v733_v45 = vrot.slane %v3326_v10, 4 }
  0x85   :  { %3281 = vst [vmem:[#allocation125_spill] sm:$0xff] %v2236_v36  ;;  %3282 = vst [vmem:[#allocation126_spill] sm:$0xff] %v2239_v42  ;;  %v3295_v26 = vld [vmem:[#allocation70_spill] sm:$0xff]  ;;  %v3296_v46 = vld [vmem:[#allocation71_spill] sm:$0xff]  ;;  %v830_v55 = vsel %vm732_vm3, %v828_v48, %v829_v58  ;;  %v3322_v48 = vmax.f32 %v3320_v19, %v3321_v11  ;;  %v734_v29 = vrot.slane %v3327_v16, 4  ;;  %v748_v10 = vrot.slane %v3043_v50, 4 }
  0x86   :  { %3283 = vst [vmem:[#allocation127_spill] sm:$0xff] %v2242_v9  ;;  %3284 = vst [vmem:[#allocation128_spill] sm:$0xff] %v2245_v5  ;;  %v3297_v28 = vld [vmem:[#allocation72_spill] sm:$0xff]  ;;  %v3299_v51 = vld [vmem:[#allocation74_spill] sm:$0xff]  ;;  %v832_v53 = vsel %vm732_vm3, %v829_v58, %v831_v0  ;;  %v2323_v62 = vmax.f32 %v3318_v63, %v830_v55 }
  0x87   :  { %3285 = vst [vmem:[#allocation129_spill] sm:$0xff] %v2248_v7  ;;  %3286 = vst [vmem:[#allocation130_spill] sm:$0xff] %v2251_v34  ;;  %v3305_v57 = vld [vmem:[#allocation80_spill] sm:$0xff]  ;;  %v2328_v30 = vmax.f32 %v3322_v48, %v832_v53  ;;  %v3328_v63 = vld [vmem:[#allocation9_spill] sm:$0xff]  ;;  %v735_v16 = vsel %vm732_vm3, %v733_v45, %v734_v29 }
  0x88   :  { %3319 = vst [vmem:[#allocation65_spill] sm:$0xff] %v2323_v62  ;;  %v736_v44 = vrot.slane %v3328_v63, 4  ;;  %v3329_v55 = vld [vmem:[#allocation10_spill] sm:$0xff]  ;;  %v3330_v11 = vld [vmem:[#allocation11_spill] sm:$0xff]  ;;  %v3331_v19 = vld [vmem:[#allocation12_spill] sm:$0xff] }
  0x89   :  { %3323 = vst [vmem:[#allocation66_spill] sm:$0xff] %v2328_v30  ;;  %v738_v62 = vrot.slane %v3329_v55, 4  ;;  %v739_v53 = vrot.slane %v3330_v11, 4  ;;  %v741_v48 = vrot.slane %v3331_v19, 4  ;;  %v3332_v30 = vld [vmem:[#allocation7_spill] sm:$0xff]  ;;  %v3333_v54 = vld [vmem:[#allocation8_spill] sm:$0xff] }
  0x8a   :  { %v743_v58 = vrot.slane %v3332_v30, 4  ;;  %v744_v23 = vrot.slane %v3333_v54, 4  ;;  %v3334_v43 = vld [vmem:[#allocation13_spill] sm:$0xff]  ;;  %v3336_v42 = vld [vmem:[#allocation18_spill] sm:$0xff]  ;;  %v3337_v39 = vld [vmem:[#allocation15_spill] sm:$0xff]  ;;  %v754_v30 = vrot.slane %v3338_v27, 4  ;;  %v737_v50 = vsel %vm732_vm3, %v734_v29, %v736_v44 }
  0x8b   :  { %v746_v36 = vrot.slane %v3334_v43, 4  ;;  %v3335_v63 = vld [vmem:[#allocation17_spill] sm:$0xff]  ;;  %v751_v11 = vrot.slane %v3336_v42, 4  ;;  %v753_v19 = vrot.slane %v3337_v39, 4  ;;  %v756_v54 = vrot.slane %v3339_v14, 4  ;;  %v3342_v5 = vld [vmem:[#allocation22_spill] sm:$0xff] }
  0x8c   :  { %v749_v55 = vrot.slane %v3335_v63, 4  ;;  %v740_v63 = vsel %vm732_vm3, %v738_v62, %v739_v53  ;;  %v742_v42 = vsel %vm732_vm3, %v739_v53, %v741_v48  ;;  %v745_v39 = vsel %vm732_vm3, %v743_v58, %v744_v23  ;;  %v3343_v15 = vld [vmem:[#allocation25_spill] sm:$0xff]  ;;  %v3344_v43 = vld [vmem:[#allocation26_spill] sm:$0xff]  ;;  %v3345_v44 = vld [vmem:[#allocation19_spill] sm:$0xff] }
  0x8d   :  { %v747_v27 = vsel %vm732_vm3, %v744_v23, %v746_v36  ;;  %v758_v56 = vrot.slane %v3342_v5, 4  ;;  %v759_v7 = vrot.slane %v3343_v15, 4  ;;  %v761_v9 = vrot.slane %v3344_v43, 4  ;;  %v3346_v48 = vld [vmem:[#allocation20_spill] sm:$0xff]  ;;  %v3347_v34 = vld [vmem:[#allocation27_spill] sm:$0xff]  ;;  %v3349_v61 = vld [vmem:[#allocation29_spill] sm:$0xff] }
  0x8e   :  { %v750_v14 = vsel %vm732_vm3, %v748_v10, %v749_v55  ;;  %v752_v45 = vsel %vm732_vm3, %v749_v55, %v751_v11  ;;  %v755_v29 = vsel %vm732_vm3, %v753_v19, %v754_v30  ;;  %v757_v62 = vsel %vm732_vm3, %v754_v30, %v756_v54  ;;  %v3348_v36 = vld [vmem:[#allocation28_spill] sm:$0xff]  ;;  %v3351_v52 = vld [vmem:[#allocation23_spill] sm:$0xff]  ;;  %v3353_v11 = vld [vmem:[#allocation33_spill] sm:$0xff] }
  0x8f   :  { %v763_v53 = vrot.slane %v3345_v44, 4  ;;  %v764_v58 = vrot.slane %v3346_v48, 4  ;;  %v766_v23 = vrot.slane %v3347_v34, 4  ;;  %v768_v10 = vrot.slane %v3348_v36, 4  ;;  %v3352_v0 = vld [vmem:[#allocation24_spill] sm:$0xff]  ;;  %v3354_v54 = vld [vmem:[#allocation34_spill] sm:$0xff] }
  0x90   :  { %v769_v5 = vrot.slane %v3349_v61, 4  ;;  %v771_v15 = vrot.slane %v3350_v25, 4  ;;  %v773_v43 = vrot.slane %v3351_v52, 4  ;;  %v774_v55 = vrot.slane %v3352_v0, 4  ;;  %v3355_v40 = vld [vmem:[#allocation37_spill] sm:$0xff] }
  0x91   :  { %v776_v19 = vrot.slane %v3353_v11, 4  ;;  %v760_v30 = vsel %vm732_vm3, %v758_v56, %v759_v7  ;;  %v778_v44 = vrot.slane %v3354_v54, 4  ;;  %v779_v48 = vrot.slane %v3355_v40, 4 }
  0x92   :  { %v3356_v34 = vmax.f32 %v1861_v24, %v2095_v6  ;;  %v3357_v61 = vmax.f32 %v1867_v37, %v2098_v38  ;;  %v3358_v52 = vmax.f32 %v1873_v60, %v2101_v49  ;;  %v3359_v11 = vmax.f32 %v1879_v13, %v2104_v12  ;;  %v3361_v37 = vld [vmem:[#allocation38_spill] sm:$0xff] }
  0x93   :  { %v3360_v54 = vmax.f32 %v1885_v8, %v2107_v31  ;;  %v762_v22 = vsel %vm732_vm3, %v759_v7, %v761_v9  ;;  %v765_v24 = vsel %vm732_vm3, %v763_v53, %v764_v58  ;;  %v2402_v6 = vsel %vm732_vm3, %v764_v58, %v766_v23  ;;  %v3362_v31 = vld [vmem:[#allocation31_spill] sm:$0xff]  ;;  %v3363_v7 = vld [vmem:[#allocation32_spill] sm:$0xff] }
  0x94   :  { %v873_v36 = vmax.f32 %v3356_v34, %v735_v16  ;;  %v874_v25 = vmax.f32 %v3357_v61, %v737_v50  ;;  %v875_v0 = vmax.f32 %v3358_v52, %v740_v63  ;;  %v876_v56 = vmax.f32 %v3359_v11, %v742_v42  ;;  %v3365_v42 = vld [vmem:[#allocation98_spill] sm:$0xff]  ;;  %v3370_v61 = vld [vmem:[#allocation44_spill] sm:$0xff] }
  0x95   :  { %v877_v40 = vmax.f32 %v3360_v54, %v745_v39  ;;  %v781_v38 = vrot.slane %v3361_v37, 4  ;;  %v2406_v60 = vsel %vm732_vm3, %v768_v10, %v769_v5  ;;  %v2409_v49 = vsel %vm732_vm3, %v769_v5, %v771_v15  ;;  %v3367_v15 = vld [vmem:[#allocation41_spill] sm:$0xff] }
  0x96   :  { %v2412_v13 = vsel %vm732_vm3, %v773_v43, %v774_v55  ;;  %v2415_v8 = vsel %vm732_vm3, %v774_v55, %v776_v19  ;;  %v2418_v12 = vsel %vm732_vm3, %v778_v44, %v779_v48  ;;  %v783_v9 = vrot.slane %v3362_v31, 4  ;;  %v3368_v55 = vld [vmem:[#allocation42_spill] sm:$0xff]  ;;  %v3369_v44 = vld [vmem:[#allocation43_spill] sm:$0xff] }
  0x97   :  { %v784_v16 = vrot.slane %v3363_v7, 4  ;;  %v3364_v50 = vmax.f32 %v3287_v3, %v2110_v1  ;;  %v3366_v39 = vmax.f32 %v3288_v35, %v3365_v42  ;;  %v913_v58 = vmax.f32 %v873_v36, %v875_v0  ;;  %v3371_v1 = vld [vmem:[#allocation35_spill] sm:$0xff]  ;;  %v3373_v36 = vld [vmem:[#allocation45_spill] sm:$0xff] }
  0x98   :  { %v914_v23 = vmax.f32 %v874_v25, %v876_v56  ;;  %v915_v10 = vmax.f32 %v875_v0, %v877_v40  ;;  %v2429_v5 = vsel %vm732_vm3, %v779_v48, %v781_v38  ;;  %v786_v43 = vrot.slane %v3367_v15, 4  ;;  %v3374_v48 = vld [vmem:[#allocation67_spill] sm:$0xff] }
  0x99   :  { %v878_v63 = vmax.f32 %v3364_v50, %v747_v27  ;;  %v879_v53 = vmax.f32 %v3366_v39, %v750_v14  ;;  %v788_v19 = vrot.slane %v3368_v55, 4  ;;  %v789_v34 = vrot.slane %v3369_v44, 4  ;;  %v3372_v27 = vld [vmem:[#allocation36_spill] sm:$0xff]  ;;  %v3375_v0 = vld [vmem:[#allocation99_spill] sm:$0xff] }
  0x9a   :  { %v791_v52 = vrot.slane %v3370_v61, 4  ;;  %v793_v3 = vrot.slane %v3371_v1, 4  ;;  %v794_v11 = vrot.slane %v3372_v27, 4  ;;  %v2438_v14 = vsel %vm732_vm3, %v783_v9, %v784_v16  ;;  %v3377_v38 = vld [vmem:[#allocation103_spill] sm:$0xff]  ;;  %v3379_v9 = vld [vmem:[#allocation46_spill] sm:$0xff]  ;;  %v3380_v61 = vld [vmem:[#allocation49_spill] sm:$0xff] }
  0x9b   :  { %v916_v35 = vmax.f32 %v876_v56, %v878_v63  ;;  %v796_v25 = vrot.slane %v3373_v36, 4  ;;  %v3376_v54 = vmax.f32 %v3374_v48, %v3375_v0  ;;  %v3378_v31 = vmax.f32 %v3293_v17, %v3377_v38 }
  0x9c   :  { %v917_v50 = vmax.f32 %v877_v40, %v879_v53  ;;  %v945_v42 = vmax.f32 %v913_v58, %v877_v40  ;;  %v946_v39 = vmax.f32 %v914_v23, %v878_v63  ;;  %v947_v15 = vmax.f32 %v915_v10, %v879_v53 }
  0x9d   :  { %v880_v37 = vmax.f32 %v3376_v54, %v752_v45  ;;  %v881_v7 = vmax.f32 %v3378_v31, %v755_v29  ;;  %v2448_v55 = vsel %vm732_vm3, %v784_v16, %v786_v43  ;;  %v2451_v56 = vsel %vm732_vm3, %v788_v19, %v789_v34  ;;  %v3381_v16 = vld [vmem:[#allocation104_spill] sm:$0xff]  ;;  %v3383_v43 = vld [vmem:[#allocation105_spill] sm:$0xff] }
  0x9e   :  { %v798_v44 = vrot.slane %v3379_v9, 4  ;;  %v799_v1 = vrot.slane %v3380_v61, 4  ;;  %v2456_v45 = vsel %vm732_vm3, %v789_v34, %v791_v52  ;;  %v2459_v17 = vsel %vm732_vm3, %v793_v3, %v794_v11  ;;  %v3387_v54 = vld [vmem:[#allocation40_spill] sm:$0xff] }
  0x9f   :  { %v918_v29 = vmax.f32 %v878_v63, %v880_v37  ;;  %v948_v40 = vmax.f32 %v916_v35, %v880_v37  ;;  %v2462_v58 = vsel %vm732_vm3, %v794_v11, %v796_v25  ;;  %v3382_v23 = vmax.f32 %v3294_v32, %v3381_v16  ;;  %v3385_v63 = vld [vmem:[#allocation50_spill] sm:$0xff]  ;;  %v3386_v11 = vld [vmem:[#allocation39_spill] sm:$0xff] }
  0xa0   :  { %v3384_v19 = vmax.f32 %v3295_v26, %v3383_v43  ;;  %v919_v36 = vmax.f32 %v879_v53, %v881_v7  ;;  %v949_v48 = vmax.f32 %v917_v50, %v881_v7  ;;  %v977_v34 = vmax.f32 %v945_v42, %v879_v53  ;;  %v3388_v32 = vld [vmem:[#allocation106_spill] sm:$0xff]  ;;  %v3390_v50 = vld [vmem:[#allocation53_spill] sm:$0xff]  ;;  %v3391_v42 = vld [vmem:[#allocation107_spill] sm:$0xff] }
  0xa1   :  { %v882_v10 = vmax.f32 %v3382_v23, %v757_v62  ;;  %v978_v52 = vmax.f32 %v946_v39, %v880_v37  ;;  %v979_v0 = vmax.f32 %v947_v15, %v881_v7  ;;  %v2471_v3 = vsel %vm732_vm3, %v798_v44, %v799_v1 }
  0xa2   :  { %v883_v27 = vmax.f32 %v3384_v19, %v760_v30  ;;  %v801_v35 = vrot.slane %v3385_v63, 4  ;;  %v803_v25 = vrot.slane %v3386_v11, 4  ;;  %v804_v38 = vrot.slane %v3387_v54, 4 }
  0xa3   :  { %v3389_v62 = vmax.f32 %v3296_v46, %v3388_v32  ;;  %v920_v26 = vmax.f32 %v880_v37, %v882_v10  ;;  %v950_v30 = vmax.f32 %v918_v29, %v882_v10  ;;  %v980_v9 = vmax.f32 %v948_v40, %v882_v10  ;;  %v3393_v46 = vld [vmem:[#allocation54_spill] sm:$0xff]  ;;  %v3394_v37 = vld [vmem:[#allocation108_spill] sm:$0xff] }
  0xa4   :  { %v806_v53 = vrot.slane %v3390_v50, 4  ;;  %v3392_v39 = vmax.f32 %v3297_v28, %v3391_v42  ;;  %v921_v44 = vmax.f32 %v881_v7, %v883_v27  ;;  %v951_v61 = vmax.f32 %v919_v36, %v883_v27  ;;  %v3400_v50 = vld [vmem:[#allocation56_spill] sm:$0xff] }
  0xa5   :  { %v884_v31 = vmax.f32 %v3389_v62, %v762_v22  ;;  %v981_v16 = vmax.f32 %v949_v48, %v883_v27  ;;  %v1009_v23 = vmax.f32 %v977_v34, %v881_v7  ;;  %v1010_v43 = vmax.f32 %v978_v52, %v882_v10 }
  0xa6   :  { %v885_v15 = vmax.f32 %v3392_v39, %v765_v24  ;;  %v1011_v19 = vmax.f32 %v979_v0, %v883_v27  ;;  %v2484_v63 = vsel %vm732_vm3, %v799_v1, %v801_v35  ;;  %v808_v22 = vrot.slane %v3393_v46, 4  ;;  %v3401_v39 = vld [vmem:[#allocation110_spill] sm:$0xff]  ;;  %v3418_v46 = vld [vmem:[#allocation83_spill] sm:$0xff] }
  0xa7   :  { %v3395_v29 = vmax.f32 %v3298_v2, %v3394_v37  ;;  %v3396_v28 = vmax.f32 %v3299_v51, %v2158_v41  ;;  %v922_v36 = vmax.f32 %v882_v10, %v884_v31  ;;  %v952_v48 = vmax.f32 %v920_v26, %v884_v31  ;;  %v3398_v41 = vld [vmem:[#allocation109_spill] sm:$0xff] }
  0xa8   :  { %v982_v7 = vmax.f32 %v950_v30, %v884_v31  ;;  %v1012_v34 = vmax.f32 %v980_v9, %v884_v31  ;;  %v923_v52 = vmax.f32 %v883_v27, %v885_v15  ;;  %v953_v0 = vmax.f32 %v921_v44, %v885_v15 }
  0xa9   :  { %v886_v40 = vmax.f32 %v3395_v29, %v2402_v6  ;;  %v887_v24 = vmax.f32 %v3396_v28, %v2406_v60  ;;  %v983_v1 = vmax.f32 %v951_v61, %v885_v15  ;;  %v1013_v35 = vmax.f32 %v981_v16, %v885_v15  ;;  %v3397_v6 = vld [vmem:[#allocation55_spill] sm:$0xff] }
  0xaa   :  { %v1042_v11 = vsel %vm1041_vm4, %v1009_v23, 0.0  ;;  %v1043_v54 = vsel %vm1041_vm4, %v1010_v43, 0.0  ;;  %v1045_v2 = vsel %vm1041_vm4, %v1011_v19, 0.0  ;;  %v809_v32 = vrot.slane %v3397_v6, 4  ;;  %v3404_v29 = vld [vmem:[#allocation111_spill] sm:$0xff]  ;;  %v3423_v6 = vld [vmem:[#allocation117_spill] sm:$0xff] }
  0xab   :  { %v3399_v51 = vmax.f32 %v3300_v20, %v3398_v41  ;;  %v924_v10 = vmax.f32 %v884_v31, %v886_v40  ;;  %v1044_v62 = vadd.f32 %v1043_v54, %v1042_v11  ;;  %v954_v27 = vmax.f32 %v922_v36, %v886_v40  ;;  %v3403_v31 = vld [vmem:[#allocation47_spill] sm:$0xff] }
  0xac   :  { %v984_v26 = vmax.f32 %v952_v48, %v886_v40  ;;  %v1014_v30 = vmax.f32 %v982_v7, %v886_v40  ;;  %v1047_v9 = vsel %vm1041_vm4, %v1012_v34, 0.0  ;;  %v811_v42 = vrot.slane %v3400_v50, 4  ;;  %v3411_v50 = vld [vmem:[#allocation48_spill] sm:$0xff] }
  0xad   :  { %v888_v60 = vmax.f32 %v3399_v51, %v2409_v49  ;;  %v3402_v44 = vmax.f32 %v3301_v21, %v3401_v39  ;;  %v925_v16 = vmax.f32 %v885_v15, %v887_v24  ;;  %v1046_v23 = vadd.f32 %v1045_v2, %v1044_v62 }
  0xae   :  { %v955_v43 = vmax.f32 %v923_v52, %v887_v24  ;;  %v985_v19 = vmax.f32 %v953_v0, %v887_v24  ;;  %v1015_v20 = vmax.f32 %v983_v1, %v887_v24  ;;  %v1049_v49 = vsel %vm1041_vm4, %v1013_v35, 0.0  ;;  %v3406_v52 = vld [vmem:[#allocation78_spill] sm:$0xff]  ;;  %v3407_v0 = vld [vmem:[#allocation112_spill] sm:$0xff] }
  0xaf   :  { %v889_v61 = vmax.f32 %v3402_v44, %v2412_v13  ;;  %v813_v37 = vrot.slane %v3403_v31, 4  ;;  %v3405_v28 = vmax.f32 %v3302_v18, %v3404_v29  ;;  %v926_v48 = vmax.f32 %v886_v40, %v888_v60 }
  0xb0   :  { %v1048_v7 = vadd.f32 %v1047_v9, %v1046_v23  ;;  %v956_v34 = vmax.f32 %v924_v10, %v888_v60  ;;  %v986_v11 = vmax.f32 %v954_v27, %v888_v60  ;;  %v1016_v21 = vmax.f32 %v984_v26, %v888_v60  ;;  %v3409_v10 = vld [vmem:[#allocation113_spill] sm:$0xff] }
  0xb1   :  { %v890_v36 = vmax.f32 %v3405_v28, %v2415_v8  ;;  %v1051_v13 = vsel %vm1041_vm4, %v1014_v30, 0.0  ;;  %v2517_v15 = vsel %vm732_vm3, %v803_v25, %v804_v38  ;;  %v3408_v1 = vmax.f32 %v3406_v52, %v3407_v0 }
  0xb2   :  { %v927_v54 = vmax.f32 %v887_v24, %v889_v61  ;;  %v1050_v2 = vadd.f32 %v1049_v49, %v1048_v7  ;;  %v957_v41 = vmax.f32 %v925_v16, %v889_v61  ;;  %v987_v18 = vmax.f32 %v955_v43, %v889_v61 }
  0xb3   :  { %v891_v35 = vmax.f32 %v3408_v1, %v2418_v12  ;;  %v1017_v8 = vmax.f32 %v985_v19, %v889_v61  ;;  %v1053_v40 = vsel %vm1041_vm4, %v1015_v20, 0.0  ;;  %v2525_v51 = vsel %vm732_vm3, %v804_v38, %v806_v53  ;;  %v3414_v20 = vld [vmem:[#allocation114_spill] sm:$0xff] }
  0xb4   :  { %v3410_v25 = vmax.f32 %v3304_v59, %v3409_v10  ;;  %v928_v27 = vmax.f32 %v888_v60, %v890_v36  ;;  %v1052_v26 = vadd.f32 %v1051_v13, %v1050_v2  ;;  %v958_v30 = vmax.f32 %v926_v48, %v890_v36  ;;  %v3413_v60 = vld [vmem:[#allocation57_spill] sm:$0xff] }
  0xb5   :  { %v988_v9 = vmax.f32 %v956_v34, %v890_v36  ;;  %v1018_v12 = vmax.f32 %v986_v11, %v890_v36  ;;  %v1055_v24 = vsel %vm1041_vm4, %v1016_v21, 0.0  ;;  %v814_v39 = vrot.slane %v3411_v50, 4  ;;  %v3426_v50 = vld [vmem:[#allocation85_spill] sm:$0xff] }
  0xb6   :  { %v892_v62 = vmax.f32 %v3410_v25, %v2429_v5  ;;  %v3412_v44 = vmax.f32 %v3305_v57, %v2177_v47  ;;  %v929_v53 = vmax.f32 %v889_v61, %v891_v35  ;;  %v1054_v16 = vadd.f32 %v1053_v40, %v1052_v26  ;;  %v3416_v61 = vld [vmem:[#allocation115_spill] sm:$0xff]  ;;  %v3421_v40 = vld [vmem:[#allocation58_spill] sm:$0xff]  ;;  %v3422_v25 = vld [vmem:[#allocation84_spill] sm:$0xff] }
  0xb7   :  { %v959_v23 = vmax.f32 %v927_v54, %v891_v35  ;;  %v989_v43 = vmax.f32 %v957_v41, %v891_v35  ;;  %v1019_v59 = vmax.f32 %v987_v18, %v891_v35  ;;  %v1057_v5 = vsel %vm1041_vm4, %v1017_v8, 0.0 }
  0xb8   :  { %v893_v38 = vmax.f32 %v3412_v44, %v2438_v14  ;;  %v816_v19 = vrot.slane %v3413_v60, 4  ;;  %v3415_v49 = vmax.f32 %v3306_v4, %v3414_v20  ;;  %v930_v28 = vmax.f32 %v890_v36, %v892_v62  ;;  %v3427_v44 = vld [vmem:[#allocation118_spill] sm:$0xff] }
  0xb9   :  { %v1056_v48 = vadd.f32 %v1055_v24, %v1054_v16  ;;  %v960_v7 = vmax.f32 %v928_v27, %v892_v62  ;;  %v990_v34 = vmax.f32 %v958_v30, %v892_v62  ;;  %v1020_v47 = vmax.f32 %v988_v9, %v892_v62  ;;  %v3429_v20 = vld [vmem:[#allocation86_spill] sm:$0xff] }
  0xba   :  { %v894_v29 = vmax.f32 %v3415_v49, %v2448_v55  ;;  %v1059_v57 = vsel %vm1041_vm4, %v1018_v12, 0.0  ;;  %v2549_v14 = vsel %vm732_vm3, %v808_v22, %v809_v32  ;;  %v3417_v11 = vmax.f32 %v3307_v33, %v3416_v61  ;;  %v3419_v22 = vld [vmem:[#allocation116_spill] sm:$0xff]  ;;  %v3430_v49 = vld [vmem:[#allocation119_spill] sm:$0xff] }
  0xbb   :  { %v931_v55 = vmax.f32 %v891_v35, %v893_v38  ;;  %v1058_v36 = vadd.f32 %v1057_v5, %v1056_v48  ;;  %v961_v21 = vmax.f32 %v929_v53, %v893_v38  ;;  %v991_v13 = vmax.f32 %v959_v23, %v893_v38 }
  0xbc   :  { %v895_v4 = vmax.f32 %v3417_v11, %v2451_v56  ;;  %v1021_v52 = vmax.f32 %v989_v43, %v893_v38  ;;  %v1061_v0 = vsel %vm1041_vm4, %v1019_v59, 0.0  ;;  %v2559_v1 = vsel %vm732_vm3, %v809_v32, %v811_v42  ;;  %v3432_v11 = vld [vmem:[#allocation87_spill] sm:$0xff] }
  0xbd   :  { %v3420_v54 = vmax.f32 %v3418_v46, %v3419_v22  ;;  %v932_v41 = vmax.f32 %v892_v62, %v894_v29  ;;  %v1060_v33 = vadd.f32 %v1059_v57, %v1058_v36  ;;  %v962_v56 = vmax.f32 %v930_v28, %v894_v29  ;;  %v3425_v62 = vld [vmem:[#allocation59_spill] sm:$0xff]  ;;  %v3436_v22 = vld [vmem:[#allocation88_spill] sm:$0xff] }
  0xbe   :  { %v992_v35 = vmax.f32 %v960_v7, %v894_v29  ;;  %v1022_v18 = vmax.f32 %v990_v34, %v894_v29  ;;  %v1063_v8 = vsel %vm1041_vm4, %v1020_v47, 0.0  ;;  %v818_v10 = vrot.slane %v3421_v40, 4  ;;  %v3440_v40 = vld [vmem:[#allocation89_spill] sm:$0xff] }
  0xbf   :  { %v896_v2 = vmax.f32 %v3420_v54, %v2456_v45  ;;  %v3424_v27 = vmax.f32 %v3422_v25, %v3423_v6  ;;  %v933_v42 = vmax.f32 %v893_v38, %v895_v4  ;;  %v1062_v26 = vadd.f32 %v1061_v0, %v1060_v33  ;;  %v3437_v54 = vld [vmem:[#allocation121_spill] sm:$0xff]  ;;  %v3441_v25 = vld [vmem:[#allocation122_spill] sm:$0xff] }
  0xc0   :  { %v963_v30 = vmax.f32 %v931_v55, %v895_v4  ;;  %v993_v9 = vmax.f32 %v961_v21, %v895_v4  ;;  %v1023_v12 = vmax.f32 %v991_v13, %v895_v4  ;;  %v1065_v45 = vsel %vm1041_vm4, %v1021_v52, 0.0  ;;  %v3433_v55 = vld [vmem:[#allocation120_spill] sm:$0xff] }
  0xc1   :  { %v897_v32 = vmax.f32 %v3424_v27, %v2459_v17  ;;  %v819_v24 = vrot.slane %v3425_v62, 4  ;;  %v3428_v53 = vmax.f32 %v3426_v50, %v3427_v44  ;;  %v934_v23 = vmax.f32 %v894_v29, %v896_v2  ;;  %v3444_v50 = vld [vmem:[#allocation123_spill] sm:$0xff] }
  0xc2   :  { %v1064_v43 = vadd.f32 %v1063_v8, %v1062_v26  ;;  %v964_v59 = vmax.f32 %v932_v41, %v896_v2  ;;  %v994_v5 = vmax.f32 %v962_v56, %v896_v2  ;;  %v1024_v60 = vmax.f32 %v992_v35, %v896_v2 }
  0xc3   :  { %v898_v16 = vmax.f32 %v3428_v53, %v2462_v58  ;;  %v1067_v17 = vsel %vm1041_vm4, %v1022_v18, 0.0  ;;  %v815_v38 = vsel %vm732_vm3, %v813_v37, %v814_v39  ;;  %v3431_v28 = vmax.f32 %v3429_v20, %v3430_v49  ;;  %v3447_v20 = vld [vmem:[#allocation91_spill] sm:$0xff]  ;;  %v3448_v49 = vld [vmem:[#allocation124_spill] sm:$0xff] }
  0xc4   :  { %v935_v7 = vmax.f32 %v895_v4, %v897_v32  ;;  %v1066_v34 = vadd.f32 %v1065_v45, %v1064_v43  ;;  %v965_v47 = vmax.f32 %v933_v42, %v897_v32  ;;  %v995_v58 = vmax.f32 %v963_v30, %v897_v32  ;;  %v3435_v4 = vld [vmem:[#allocation60_spill] sm:$0xff]  ;;  %v3443_v45 = vld [vmem:[#allocation90_spill] sm:$0xff] }
  0xc5   :  { %v899_v48 = vmax.f32 %v3431_v28, %v2471_v3  ;;  %v1025_v29 = vmax.f32 %v993_v9, %v897_v32  ;;  %v1069_v57 = vsel %vm1041_vm4, %v1023_v12, 0.0  ;;  %v817_v61 = vsel %vm732_vm3, %v814_v39, %v816_v19 }
  0xc6   :  { %v3434_v31 = vmax.f32 %v3432_v11, %v3433_v55  ;;  %v936_v37 = vmax.f32 %v896_v2, %v898_v16  ;;  %v1068_v21 = vadd.f32 %v1067_v17, %v1066_v34  ;;  %v966_v13 = vmax.f32 %v934_v23, %v898_v16  ;;  %v3439_v2 = vld [vmem:[#allocation51_spill] sm:$0xff]  ;;  %v3451_v11 = vld [vmem:[#allocation92_spill] sm:$0xff]  ;;  %v3452_v55 = vld [vmem:[#allocation125_spill] sm:$0xff] }
  0xc7   :  { %v996_v52 = vmax.f32 %v964_v59, %v898_v16  ;;  %v1026_v0 = vmax.f32 %v994_v5, %v898_v16  ;;  %v1071_v3 = vsel %vm1041_vm4, %v1024_v60, 0.0  ;;  %v821_v46 = vrot.slane %v3435_v4, 4  ;;  %v3446_v60 = vld [vmem:[#allocation52_spill] sm:$0xff]  ;;  %v3454_v4 = vld [vmem:[#allocation93_spill] sm:$0xff] }
  0xc8   :  { %v900_v36 = vmax.f32 %v3434_v31, %v2484_v63  ;;  %v3438_v41 = vmax.f32 %v3436_v22, %v3437_v54  ;;  %v937_v39 = vmax.f32 %v897_v32, %v899_v48  ;;  %v1070_v19 = vadd.f32 %v1069_v57, %v1068_v21  ;;  %v3455_v22 = vld [vmem:[#allocation126_spill] sm:$0xff] }
  0xc9   :  { %v967_v56 = vmax.f32 %v935_v7, %v899_v48  ;;  %v997_v35 = vmax.f32 %v965_v47, %v899_v48  ;;  %v1027_v18 = vmax.f32 %v995_v58, %v899_v48  ;;  %v1073_v63 = vsel %vm1041_vm4, %v1025_v29, 0.0 }
  0xca   :  { %v901_v33 = vmax.f32 %v3438_v41, %v2517_v15  ;;  %v823_v8 = vrot.slane %v3439_v2, 4  ;;  %v3442_v6 = vmax.f32 %v3440_v40, %v3441_v25  ;;  %v938_v42 = vmax.f32 %v898_v16, %v900_v36  ;;  %v3458_v2 = vld [vmem:[#allocation127_spill] sm:$0xff] }
  0xcb   :  { %v1072_v26 = vadd.f32 %v1071_v3, %v1070_v19  ;;  %v968_v30 = vmax.f32 %v936_v37, %v900_v36  ;;  %v998_v9 = vmax.f32 %v966_v13, %v900_v36  ;;  %v1028_v12 = vmax.f32 %v996_v52, %v900_v36 }
  0xcc   :  { %v902_v27 = vmax.f32 %v3442_v6, %v2525_v51  ;;  %v1075_v15 = vsel %vm1041_vm4, %v1026_v0, 0.0  ;;  %v820_v32 = vsel %vm732_vm3, %v818_v10, %v819_v24  ;;  %v3445_v44 = vmax.f32 %v3443_v45, %v3444_v50 }
  0xcd   :  { %v939_v23 = vmax.f32 %v899_v48, %v901_v33  ;;  %v1074_v43 = vadd.f32 %v1073_v63, %v1072_v26  ;;  %v969_v59 = vmax.f32 %v937_v39, %v901_v33  ;;  %v999_v51 = vmax.f32 %v967_v56, %v901_v33  ;;  %v3450_v48 = vld [vmem:[#allocation61_spill] sm:$0xff]  ;;  %v3457_v63 = vld [vmem:[#allocation94_spill] sm:$0xff]  ;;  %v3460_v26 = vld [vmem:[#allocation95_spill] sm:$0xff] }
  0xce   :  { %v903_v53 = vmax.f32 %v3445_v44, %v2549_v14  ;;  %v1029_v16 = vmax.f32 %v997_v35, %v901_v33  ;;  %v1077_v5 = vsel %vm1041_vm4, %v1027_v18, 0.0  ;;  %v824_v17 = vrot.slane %v3446_v60, 4 }
  0xcf   :  { %v3449_v28 = vmax.f32 %v3447_v20, %v3448_v49  ;;  %v940_v10 = vmax.f32 %v900_v36, %v902_v27  ;;  %v1076_v34 = vadd.f32 %v1075_v15, %v1074_v43  ;;  %v970_v47 = vmax.f32 %v938_v42, %v902_v27  ;;  %v3466_v20 = vld [vmem:[#allocation97_spill] sm:$0xff]  ;;  %v3467_v49 = vld [vmem:[#allocation130_spill] sm:$0xff] }
  0xd0   :  { %v1000_v58 = vmax.f32 %v968_v30, %v902_v27  ;;  %v1030_v29 = vmax.f32 %v998_v9, %v902_v27  ;;  %v1079_v14 = vsel %vm1041_vm4, %v1028_v12, 0.0  ;;  %v826_v57 = vrot.slane %v3450_v48, 4  ;;  %v3461_v30 = vld [vmem:[#allocation128_spill] sm:$0xff] }
  0xd1   :  { %v904_v7 = vmax.f32 %v3449_v28, %v2559_v1  ;;  %v3453_v31 = vmax.f32 %v3451_v11, %v3452_v55  ;;  %v941_v21 = vmax.f32 %v901_v33, %v903_v53  ;;  %v1078_v13 = vadd.f32 %v1077_v5, %v1076_v34 }
  0xd2   :  { %v971_v52 = vmax.f32 %v939_v23, %v903_v53  ;;  %v1001_v0 = vmax.f32 %v969_v59, %v903_v53  ;;  %v1031_v3 = vmax.f32 %v999_v51, %v903_v53  ;;  %v1081_v1 = vsel %vm1041_vm4, %v1029_v16, 0.0  ;;  %v3464_v23 = vld [vmem:[#allocation129_spill] sm:$0xff] }
  0xd3   :  { %v905_v37 = vmax.f32 %v3453_v31, %v815_v38  ;;  %v822_v36 = vsel %vm732_vm3, %v819_v24, %v821_v46  ;;  %v3456_v54 = vmax.f32 %v3454_v4, %v3455_v22  ;;  %v942_v39 = vmax.f32 %v902_v27, %v904_v7 }
  0xd4   :  { %v1080_v19 = vadd.f32 %v1079_v14, %v1078_v13  ;;  %v972_v56 = vmax.f32 %v940_v10, %v904_v7  ;;  %v1002_v35 = vmax.f32 %v970_v47, %v904_v7  ;;  %v1032_v38 = vmax.f32 %v1000_v58, %v904_v7 }
  0xd5   :  { %v906_v41 = vmax.f32 %v3456_v54, %v817_v61  ;;  %v1083_v33 = vsel %vm1041_vm4, %v1030_v29, 0.0  ;;  %v825_v18 = vsel %vm732_vm3, %v823_v8, %v824_v17  ;;  %v3459_v40 = vmax.f32 %v3457_v63, %v3458_v2 }
  0xd6   :  { %v943_v62 = vmax.f32 %v903_v53, %v905_v37  ;;  %v1082_v6 = vadd.f32 %v1081_v1, %v1080_v19  ;;  %v973_v24 = vmax.f32 %v941_v21, %v905_v37  ;;  %v1003_v46 = vmax.f32 %v971_v52, %v905_v37  ;;  %v3463_v53 = vld [vmem:[#allocation96_spill] sm:$0xff]  ;;  %v3469_v52 = vld [vmem:[#allocation65_spill] sm:$0xff] }
  0xd7   :  { %v907_v25 = vmax.f32 %v3459_v40, %v820_v32  ;;  %v1033_v42 = vmax.f32 %v1001_v0, %v905_v37  ;;  %v1085_v61 = vsel %vm1041_vm4, %v1031_v3, 0.0  ;;  %v827_v27 = vsel %vm732_vm3, %v824_v17, %v826_v57 }
  0xd8   :  { %v3462_v9 = vmax.f32 %v3460_v26, %v3461_v30  ;;  %v944_v15 = vmax.f32 %v904_v7, %v906_v41  ;;  %v1084_v45 = vadd.f32 %v1083_v33, %v1082_v6  ;;  %v974_v8 = vmax.f32 %v942_v39, %v906_v41 }
  0xd9   :  { %v1004_v50 = vmax.f32 %v972_v56, %v906_v41  ;;  %v1034_v44 = vmax.f32 %v1002_v35, %v906_v41  ;;  %v1087_v32 = vsel %vm1041_vm4, %v1032_v38, 0.0  ;;  %v3465_v43 = vmax.f32 %v3463_v53, %v3464_v23 }
  0xda   :  { %v908_v12 = vmax.f32 %v3462_v9, %v822_v36  ;;  %v1086_v51 = vadd.f32 %v1085_v61, %v1084_v45  ;;  %v975_v16 = vmax.f32 %v943_v62, %v907_v25  ;;  %v1005_v5 = vmax.f32 %v973_v24, %v907_v25  ;;  %v3470_v36 = vld [vmem:[#allocation66_spill] sm:$0xff] }
  0xdb   :  { %v909_v59 = vmax.f32 %v3465_v43, %v825_v18  ;;  %v1035_v60 = vmax.f32 %v1003_v46, %v907_v25  ;;  %v1089_v17 = vsel %vm1041_vm4, %v1033_v42, 0.0  ;;  %v3468_v28 = vmax.f32 %v3466_v20, %v3467_v49 }
  0xdc   :  { %v1088_v10 = vadd.f32 %v1087_v32, %v1086_v51  ;;  %v976_v34 = vmax.f32 %v944_v15, %v908_v12  ;;  %v1006_v47 = vmax.f32 %v974_v8, %v908_v12  ;;  %v1036_v58 = vmax.f32 %v1004_v50, %v908_v12 }
  0xdd   :  { %v910_v7 = vmax.f32 %v3468_v28, %v827_v27  ;;  %v1091_v29 = vsel %vm1041_vm4, %v1034_v44, 0.0  ;;  %v1007_v48 = vmax.f32 %v975_v16, %v909_v59  ;;  %v1037_v57 = vmax.f32 %v1005_v5, %v909_v59 }
  0xde   :  { %v1090_v14 = vadd.f32 %v1089_v17, %v1088_v10  ;;  %v1093_v11 = vsel %vm1041_vm4, %v1035_v60, 0.0  ;;  %v1095_v21 = vsel %vm1041_vm4, %v1036_v58, 0.0 }
  0xdf   :  { %v1008_v31 = vmax.f32 %v976_v34, %v910_v7  ;;  %v1038_v37 = vmax.f32 %v1006_v47, %v910_v7  ;;  %v1039_v0 = vmax.f32 %v1007_v48, %v3469_v52  ;;  %v1097_v3 = vsel %vm1041_vm4, %v1037_v57, 0.0 }
  0xe0   :  { %v1092_v55 = vadd.f32 %v1091_v29, %v1090_v14 }
  0xe1   :  { %v1040_v4 = vmax.f32 %v1008_v31, %v3470_v36  ;;  %v1099_v22 = vsel %vm1041_vm4, %v1038_v37, 0.0  ;;  %v1101_v41 = vsel %vm1041_vm4, %v1039_v0, 0.0 }
  0xe2   :  { %v1094_v13 = vadd.f32 %v1093_v11, %v1092_v55 }
  0xe3   :  { %v1103_v19 = vsel %vm1041_vm4, %v1040_v4, 0.0 }
  0xe4   :  { %v1096_v1 = vadd.f32 %v1095_v21, %v1094_v13 }
  0xe6   :  { %v1098_v54 = vadd.f32 %v1097_v3, %v1096_v1 }
  0xe8   :  { %v1100_v39 = vadd.f32 %v1099_v22, %v1098_v54 }
  0xea   :  { %v1102_v56 = vadd.f32 %v1101_v41, %v1100_v39 }
  0xec   :  { %v1104_v35 = vadd.f32 %v1103_v19, %v1102_v56 }
  0xee   :  { %1105 = vadd.xlane.f32.xlu0 %v1104_v35 }
 0x177   :  { %v1106_v38 = vpop.xlane.xlu0 %1105 }
 0x178   :  { %v1107_v33 = vrot.slane %v1106_v38, 4 }
 0x17a   :  { %v1108_v18 = vadd.f32 %v1107_v33, %v1106_v38 }
 0x17c   :  { %v1109_v63 = vrot.slane %v1108_v18, 2 }
 0x17e   :  { %v1110_v2 = vadd.f32 %v1109_v63, %v1108_v18 }
 0x180   :  { %v1111_v40 = vrot.slane %v1110_v2, 1 }
 0x182   :  { %v1112_v25 = vadd.f32 %v1111_v40, %v1110_v2 }
 0x184   :  { %1179 = vpush %v1112_v25 }
 0x1b5   :  { %s1180_s29 = spop %1179 }
 0x1b6   :  { %v1114_v62 = vstv %s1180_s29 }
 0x1b7   :  { %1115 = vst [vmem:[#allocation2] sm:$0xff] %v1114_v62 }
 0x1b8   :  { %1193 = shalt.err (!%p1190_p4)
}
 0x1b9   :  { %1125 = dma.vmem_to_hbm [thread:$0]  %s1123_s28, 128, %s2660_s1, [#allocation3]  }
 0x1ba   :  { %1202 = dma.done.wait [#allocation3], 128  }
 0x1bb   :  { %1203 = vsyncadd [#allocation3], 4294967168 }
 0x1bc   :  { %1129 = vsyncpa [#allocation3], 1 }

</bundles_post_ra>
